<compile_context>
chip_gen: v6e
topology: v6e:2x2x1
jax: 0.10.0
libtpu: 0.0.40
codegen_flags: <defaults>
</compile_context>

<pallas_src>
import math

import jax
import jax.numpy as jnp
from jax import lax
from jax.experimental import pallas as pl
from jax.experimental.pallas import tpu as pltpu


# ----------------------------------------------------------------------------
# Fused forward kernel
# ----------------------------------------------------------------------------
def _fused_forward_kernel(x_ref, r1_ref, b1_ref, r2_ref, b2_ref,
                          fw1_ref, fb1_ref, fw2_ref, fb2_ref,
                          o_ref, xp2_ref):
    """Full forward pass for one batch tile (everything VMEM-resident).

    x_ref  : (n, H+4, Cin*W)        H-padded input, lanes = (ci, w)
    r1_ref : (5, Cin*W, 2*C1*Wp)    banded conv1 RHS (even-w / odd-w column halves)
    b1_ref : (1, C1*Wp)
    r2_ref : (5, C1*Wp, 2*C2*Wq)    banded conv2 RHS
    b2_ref : (1, C2*Wq)
    fw1_ref: (Hq*C2*Wq, F)          fc1 weights, row blocks ordered (hq, c2, wq)
    fb1_ref: (1, F)
    fw2_ref: (F, 128)               fc_logits weights, lane-padded to 128
    fb2_ref: (1, 128)
    o_ref  : (1, n, 128)            lane-padded logits
    xp2_ref: (n, Hp+4, C1*Wp)       H-padded conv2 input staging scratch (VMEM)
    """
    n, h_pad, k1 = x_ref.shape
    Hp = (h_pad - 4) // 2
    Hq = Hp // 2
    CW1 = b1_ref.shape[1]                # C1 * Wp
    CW2 = b2_ref.shape[1]                # C2 * Wq
    cdt = r1_ref.dtype                   # matmul operand dtype (f32, or bf16 on v6e/v7x)

    def conv_pool_relu(src_ref, h_out, rhs_ref, bias, k_dim, cw_out):
        # 5x5 'same' conv + bias + 2x2/2 max-pool + ReLU, fully lane-dense:
        #   * W axis / W padding / even-odd-w pool candidates live in the banded RHS,
        #   * H axis handled by 6 stride-2 sublane reads of the H-padded source,
        # so the whole pool is elementwise maxes (no lane/sublane shuffles).
        slabs = [src_ref[:, pl.ds(j, h_out, stride=2), :]
                     .reshape(n * h_out, k_dim).astype(cdt)
                 for j in range(6)]
        r0 = rhs_ref[0]
        acc_e = jnp.dot(slabs[0], r0, preferred_element_type=jnp.float32)  # h even rows
        acc_o = jnp.dot(slabs[1], r0, preferred_element_type=jnp.float32)  # h odd rows
        for ky in range(1, 5):
            rk = rhs_ref[ky]
            acc_e = acc_e + jnp.dot(slabs[ky], rk, preferred_element_type=jnp.float32)
            acc_o = acc_o + jnp.dot(slabs[ky + 1], rk, preferred_element_type=jnp.float32)
        pooled = jnp.maximum(jnp.maximum(acc_e[:, :cw_out], acc_e[:, cw_out:]),
                             jnp.maximum(acc_o[:, :cw_out], acc_o[:, cw_out:]))
        # bias is identical across the four pooled candidates, so it commutes with max.
        return jnp.maximum(pooled + bias, 0.0)           # (n*h_out, cw_out)

    # ---- conv1 -> pool1 -> relu ----
    h1 = conv_pool_relu(x_ref, Hp, r1_ref, b1_ref[...], k1, CW1)      # (n*Hp, C1*Wp)

    # ---- stage conv2's H-padded input: zero only the 4 border rows (every step, so the
    #      kernel is megacore-safe); the interior is one contiguous 64-lane store ----
    xp2_ref[:, 0:2, :] = jnp.zeros((n, 2, CW1), xp2_ref.dtype)
    xp2_ref[:, Hp + 2:Hp + 4, :] = jnp.zeros((n, 2, CW1), xp2_ref.dtype)
    xp2_ref[:, 2:Hp + 2, :] = h1.reshape(n, Hp, CW1)

    # ---- conv2 -> pool2 -> relu ----
    h2 = conv_pool_relu(xp2_ref, Hq, r2_ref, b2_ref[...], CW1, CW2)   # (n*Hq, C2*Wq)

    # ---- fc1 + relu: accumulate per-hq row blocks (no flatten relayout / concats;
    #      fc1 weight rows were permuted in the wrapper to torch's view order) ----
    h2_3d = h2.reshape(n, Hq, CW2)
    z = jnp.dot(h2_3d[:, 0, :].astype(cdt), fw1_ref[0:CW2, :],
                preferred_element_type=jnp.float32) + fb1_ref[...]
    for hq in range(1, Hq):
        z = z + jnp.dot(h2_3d[:, hq, :].astype(cdt),
                        fw1_ref[hq * CW2:(hq + 1) * CW2, :],
                        preferred_element_type=jnp.float32)
    z = jnp.maximum(z, 0.0)

    # ---- fc_logits (kept f32; output lane-padded to 128 -> full-width store) ----
    o_ref[0] = (jnp.dot(z, fw2_ref[...], preferred_element_type=jnp.float32)
                + fb2_ref[...])


# ----------------------------------------------------------------------------
# Wrapper helpers (tiny, parameter-sized one-time layout plumbing)
# ----------------------------------------------------------------------------
def _banded_pool_rhs(wt, w_in):
    """Banded (block-Toeplitz) RHS for a 5x5 'same' conv along a row of width `w_in`,
    with the zero padding folded into the band structure and the 2x2 max-pool's
    even-w / odd-w candidates emitted as the two column halves.

    wt: (Cout, Cin, 5, 5) torch OIHW weights.
    returns (5, Cin*w_in, 2*Cout*(w_in//2));  rows = (ci, wi), cols = (half, co, wq),
    entry = wt[co, ci, ky, kx] with kx = wi - (2*wq + half) + 2 if 0 <= kx < 5 else 0.
    """
    cout, cin, _, _ = wt.shape
    wq_n = w_in // 2
    wi = jnp.arange(w_in)[:, None, None]
    half = jnp.arange(2)[None, :, None]
    wq = jnp.arange(wq_n)[None, None, :]
    kx = wi - (2 * wq + half) + 2                       # (w_in, 2, wq_n)
    valid = (kx >= 0) & (kx < 5)
    g = wt[:, :, :, jnp.clip(kx, 0, 4)] * valid[None, None, None]   # (co,ci,5,wi,2,wq)
    g = g.transpose(2, 1, 3, 4, 0, 5)                   # (5, ci, wi, half, co, wq)
    return g.reshape(5, cin * w_in, 2 * cout * wq_n)


def _pick_tile(n_batch, cap=32):
    # Divisor of N, capped (amortizes per-step overhead without bloating VMEM; raise the
    # cap to 64 for very large batches), and >=2 grid steps whenever N > 1 so the
    # "parallel" batch axis can shard across both v7x TensorCores.
    if n_batch <= 1:
        return 1
    t = min(cap, max(1, n_batch // 2))
    while n_batch % t:
        t -= 1
    return t


# ----------------------------------------------------------------------------
# Wrapper
# ----------------------------------------------------------------------------
def conv_model_forward(x_nchw, params, *, compute_dtype=jnp.float32, tile_cap=32):
    """PyTorch-compatible forward: NCHW float32 input -> (N, class_count) logits.

    `compute_dtype=jnp.bfloat16` runs the conv/fc1 matmul operands in bf16 with f32
    accumulation (v6e/v7x MXU rate, half the vreg/VMEM pressure) -- use a looser
    tolerance than 1e-3 in that case.
    """
    N, Cin, H, W = x_nchw.shape
    assert H % 4 == 0 and W % 4 == 0, "spatial dims must be divisible by 4 (two 2x2 pools)"
    C1 = params["conv1_b"].shape[0]
    C2 = params["conv2_b"].shape[0]
    F = params["fc1_b"].shape[0]
    K = params["fc2_b"].shape[0]
    Hp, Wp = H // 2, W // 2
    Hq, Wq = H // 4, W // 4
    KPAD = ((K + 127) // 128) * 128          # lane-dense logits staging width

    tile_n = _pick_tile(N, tile_cap)
    G = N // tile_n

    # --- tiny one-time layout plumbing (input + parameter sized only) ---
    # input: H-padded, channel-major / width-minor lanes: (N, H+4, Cin*W)
    xk = jnp.pad(x_nchw.astype(jnp.float32), ((0, 0), (0, 0), (2, 2), (0, 0)))
    xk = xk.transpose(0, 2, 1, 3).reshape(N, H + 4, Cin * W)
    # banded conv RHS with the W-pool folded in
    rhs1 = _banded_pool_rhs(params["conv1_w"], W).astype(compute_dtype)
    rhs2 = _banded_pool_rhs(params["conv2_w"], Wp).astype(compute_dtype)
    b1h = jnp.repeat(params["conv1_b"], Wp).reshape(1, C1 * Wp).astype(jnp.float32)
    b2h = jnp.repeat(params["conv2_b"], Wq).reshape(1, C2 * Wq).astype(jnp.float32)
    # fc1 rows permuted from torch (c,h,w) flatten order to the kernel's (h,c,w) blocks
    fw1 = params["fc1_w"].reshape(C2, Hq, Wq, F).transpose(1, 0, 2, 3)
    fw1 = fw1.reshape(Hq * C2 * Wq, F).astype(compute_dtype)
    fb1 = params["fc1_b"].reshape(1, F).astype(jnp.float32)
    # fc_logits lane-padded to KPAD (padded columns are exactly zero, sliced off below)
    fw2 = jnp.zeros((F, KPAD), jnp.float32).at[:, :K].set(params["fc2_w"])
    fb2 = jnp.zeros((1, KPAD), jnp.float32).at[0, :K].set(params["fc2_b"])

    # NOTE: weight BlockSpecs have constant index_maps (fetched once, VMEM-resident);
    # pipeline_mode=pl.Buffered(1) would shave their double-buffer copy but the total is
    # well under 1 MiB so it is left at the default.
    out = pl.pallas_call(
        _fused_forward_kernel,
        out_shape=jax.ShapeDtypeStruct((G, tile_n, KPAD), jnp.float32),
        grid=(G,),
        in_specs=[
            pl.BlockSpec((tile_n, H + 4, Cin * W), lambda i: (i, 0, 0)),
            pl.BlockSpec((5, Cin * W, 2 * C1 * Wp), lambda i: (0, 0, 0)),
            pl.BlockSpec((1, C1 * Wp), lambda i: (0, 0)),
            pl.BlockSpec((5, C1 * Wp, 2 * C2 * Wq), lambda i: (0, 0, 0)),
            pl.BlockSpec((1, C2 * Wq), lambda i: (0, 0)),
            pl.BlockSpec((Hq * C2 * Wq, F), lambda i: (0, 0)),
            pl.BlockSpec((1, F), lambda i: (0, 0)),
            pl.BlockSpec((F, KPAD), lambda i: (0, 0)),
            pl.BlockSpec((1, KPAD), lambda i: (0, 0)),
        ],
        out_specs=pl.BlockSpec((1, tile_n, KPAD), lambda i: (i, 0, 0)),
        scratch_shapes=[pltpu.VMEM((tile_n, Hp + 4, C1 * Wp), jnp.float32)],
        compiler_params=pltpu.CompilerParams(
            dimension_semantics=("parallel",),
            vmem_limit_bytes=32 * 1024 * 1024),
    )(xk, rhs1, b1h, rhs2, b2h, fw1, fb1, fw2, fb2)

    return out.reshape(N, KPAD)[:, :K]


# ----------------------------------------------------------------------------
# Plain-JAX reference (numerical sanity check, torch semantics)
# ----------------------------------------------------------------------------
def reference_forward(x_nchw, params):
    def conv(x, w, b):
        y = lax.conv_general_dilated(x, w, (1, 1), ((2, 2), (2, 2)),
                                     dimension_numbers=("NCHW", "OIHW", "NCHW"))
        return y + b[None, :, None, None]

    def pool_relu(x):
        y = lax.reduce_window(x, -jnp.inf, lax.max, (1, 1, 2, 2), (1, 1, 2, 2), "VALID")
        return jnp.maximum(y, 0.0)

    y = pool_relu(conv(x_nchw, params["conv1_w"], params["conv1_b"]))
    y = pool_relu(conv(y, params["conv2_w"], params["conv2_b"]))
    flat = y.reshape(y.shape[0], -1)                     # torch view order (C, H, W)
    h = jnp.maximum(flat @ params["fc1_w"] + params["fc1_b"], 0.0)
    return h @ params["fc2_w"] + params["fc2_b"]


# ----------------------------------------------------------------------------
# Parameter init (mirrors reset_parameters: kaiming fan_in + zero bias for convs/fc1,
# PyTorch default uniform for fc_logits).  Conv weights stored in torch OIHW layout.
# ----------------------------------------------------------------------------
def init_params(key, in_channels, conv1_width, in_channels2, conv2_width,
                flattened_dim, fc1_width, class_count):
    k1, k2, k3, k4, k5 = jax.random.split(key, 5)
    p = {}
    p["conv1_w"] = (jax.random.normal(k1, (conv1_width, in_channels, 5, 5), jnp.float32)
                    * math.sqrt(2.0 / (25 * in_channels)))
    p["conv1_b"] = jnp.zeros((conv1_width,), jnp.float32)
    p["conv2_w"] = (jax.random.normal(k2, (conv2_width, in_channels2, 5, 5), jnp.float32)
                    * math.sqrt(2.0 / (25 * in_channels2)))
    p["conv2_b"] = jnp.zeros((conv2_width,), jnp.float32)
    p["fc1_w"] = (jax.random.normal(k3, (flattened_dim, fc1_width), jnp.float32)
                  * math.sqrt(2.0 / flattened_dim))
    p["fc1_b"] = jnp.zeros((fc1_width,), jnp.float32)
    bound = 1.0 / math.sqrt(fc1_width)
    p["fc2_w"] = jax.random.uniform(k4, (fc1_width, class_count), jnp.float32,
                                    minval=-bound, maxval=bound)
    p["fc2_b"] = jax.random.uniform(k5, (class_count,), jnp.float32,
                                    minval=-bound, maxval=bound)
    return p


# TODO(synk): train_model / draw_loss (training loop, plotting) are not part of the
# forward pass and are not translated.

if __name__ == "__main__":
    # Small shapes consistent with the module:
    # in_channels=4, conv1_width=8, in_channels2=8, conv2_width=16,
    # spatial 16x16 -> flattened_dim = 16 * 4 * 4 = 256, fc1_width=32, class_count=10.
    N, Cin, H, W = 2, 4, 16, 16
    conv1_width, conv2_width, fc1_width, class_count = 8, 16, 32, 10
    flattened_dim = conv2_width * (H // 4) * (W // 4)

    key = jax.random.PRNGKey(0)
    kx_, kp_ = jax.random.split(key)
    x = jax.random.normal(kx_, (N, Cin, H, W), jnp.float32)
    params = init_params(kp_, Cin, conv1_width, conv1_width, conv2_width,
                         flattened_dim, fc1_width, class_count)

    logits = jax.block_until_ready(jax.jit(conv_model_forward)(x, params))
    ref = jax.block_until_ready(reference_forward(x, params))

    err = float(jnp.max(jnp.abs(logits - ref)))
    assert logits.shape == (N, class_count), logits.shape
    assert err < 1e-3, f"mismatch vs reference: {err}"
    print("KERNEL_OK")
</pallas_src>

<mosaic_0001>
module attributes {stable_mosaic.version = 11 : i64} {
  func.func @_fused_forward_kernel(%arg0: i32, %arg1: memref<1x20x64xf32, #tpu.memory_space<vmem>>, %arg2: memref<5x64x128xf32, #tpu.memory_space<vmem>>, %arg3: memref<1x64xf32, #tpu.memory_space<vmem>>, %arg4: memref<5x64x128xf32, #tpu.memory_space<vmem>>, %arg5: memref<1x64xf32, #tpu.memory_space<vmem>>, %arg6: memref<256x32xf32, #tpu.memory_space<vmem>>, %arg7: memref<1x32xf32, #tpu.memory_space<vmem>>, %arg8: memref<32x128xf32, #tpu.memory_space<vmem>>, %arg9: memref<1x128xf32, #tpu.memory_space<vmem>>, %arg10: memref<1x1x128xf32, #tpu.memory_space<vmem>>, %arg11: memref<1x12x64xf32, #tpu.memory_space<vmem>>) attributes {dimension_semantics = [#tpu.dimension_semantics<parallel>], iteration_bounds = array<i64: 2>, scalar_prefetch = 0 : i64, scratch_operands = 1 : i64, tpu.core_type = #tpu.core_type<tc>, window_params = [{transform_indices = @transform_0, window_bounds = array<i64: 1, 20, 64>}, {pipeline_mode = #tpu.pipeline_mode<synchronous>, transform_indices = @transform_1, window_bounds = array<i64: 5, 64, 128>}, {pipeline_mode = #tpu.pipeline_mode<synchronous>, transform_indices = @transform_2, window_bounds = array<i64: 1, 64>}, {pipeline_mode = #tpu.pipeline_mode<synchronous>, transform_indices = @transform_3, window_bounds = array<i64: 5, 64, 128>}, {pipeline_mode = #tpu.pipeline_mode<synchronous>, transform_indices = @transform_4, window_bounds = array<i64: 1, 64>}, {pipeline_mode = #tpu.pipeline_mode<synchronous>, transform_indices = @transform_5, window_bounds = array<i64: 256, 32>}, {pipeline_mode = #tpu.pipeline_mode<synchronous>, transform_indices = @transform_6, window_bounds = array<i64: 1, 32>}, {pipeline_mode = #tpu.pipeline_mode<synchronous>, transform_indices = @transform_7, window_bounds = array<i64: 32, 128>}, {pipeline_mode = #tpu.pipeline_mode<synchronous>, transform_indices = @transform_8, window_bounds = array<i64: 1, 128>}, {transform_indices = @transform_9, window_bounds = array<i64: 1, 1, 128>}]} {
    %c0 = arith.constant 0 : index
    %c0_0 = arith.constant 0 : index
    %0 = vector.load %arg3[%c0, %c0_0] : memref<1x64xf32, #tpu.memory_space<vmem>>, vector<1x64xf32>
    %c0_1 = arith.constant 0 : index
    %c0_2 = arith.constant 0 : index
    %c0_3 = arith.constant 0 : index
    %1 = tpu.strided_load %arg1[%c0_1, %c0_2, %c0_3] {strides = array<i32: 1, 2, 1>} : memref<1x20x64xf32, #tpu.memory_space<vmem>>, vector<1x8x64xf32>
    %2 = vector.shape_cast %1 : vector<1x8x64xf32> to vector<8x64xf32>
    %c0_4 = arith.constant 0 : index
    %c1 = arith.constant 1 : index
    %c0_5 = arith.constant 0 : index
    %3 = tpu.strided_load %arg1[%c0_4, %c1, %c0_5] {strides = array<i32: 1, 2, 1>} : memref<1x20x64xf32, #tpu.memory_space<vmem>>, vector<1x8x64xf32>
    %4 = vector.shape_cast %3 : vector<1x8x64xf32> to vector<8x64xf32>
    %c0_6 = arith.constant 0 : index
    %c2 = arith.constant 2 : index
    %c0_7 = arith.constant 0 : index
    %5 = tpu.strided_load %arg1[%c0_6, %c2, %c0_7] {strides = array<i32: 1, 2, 1>} : memref<1x20x64xf32, #tpu.memory_space<vmem>>, vector<1x8x64xf32>
    %6 = vector.shape_cast %5 : vector<1x8x64xf32> to vector<8x64xf32>
    %c0_8 = arith.constant 0 : index
    %c3 = arith.constant 3 : index
    %c0_9 = arith.constant 0 : index
    %7 = tpu.strided_load %arg1[%c0_8, %c3, %c0_9] {strides = array<i32: 1, 2, 1>} : memref<1x20x64xf32, #tpu.memory_space<vmem>>, vector<1x8x64xf32>
    %8 = vector.shape_cast %7 : vector<1x8x64xf32> to vector<8x64xf32>
    %c0_10 = arith.constant 0 : index
    %c4 = arith.constant 4 : index
    %c0_11 = arith.constant 0 : index
    %9 = tpu.strided_load %arg1[%c0_10, %c4, %c0_11] {strides = array<i32: 1, 2, 1>} : memref<1x20x64xf32, #tpu.memory_space<vmem>>, vector<1x8x64xf32>
    %10 = vector.shape_cast %9 : vector<1x8x64xf32> to vector<8x64xf32>
    %c0_12 = arith.constant 0 : index
    %c5 = arith.constant 5 : index
    %c0_13 = arith.constant 0 : index
    %11 = tpu.strided_load %arg1[%c0_12, %c5, %c0_13] {strides = array<i32: 1, 2, 1>} : memref<1x20x64xf32, #tpu.memory_space<vmem>>, vector<1x8x64xf32>
    %12 = vector.shape_cast %11 : vector<1x8x64xf32> to vector<8x64xf32>
    %c0_14 = arith.constant 0 : index
    %c0_15 = arith.constant 0 : index
    %c0_16 = arith.constant 0 : index
    %13 = vector.load %arg2[%c0_14, %c0_15, %c0_16] : memref<5x64x128xf32, #tpu.memory_space<vmem>>, vector<1x64x128xf32>
    %14 = vector.shape_cast %13 : vector<1x64x128xf32> to vector<64x128xf32>
    %cst = arith.constant dense<0.000000e+00> : vector<8x128xf32>
    %15 = tpu.matmul %2, %14, %cst {dimension_numbers = #tpu.dot_dimension_numbers<[1], [0], [0], [1], [0, 0, 1, 1], [], []>} : vector<8x64xf32>, vector<64x128xf32>, vector<8x128xf32> -> vector<8x128xf32>
    %cst_17 = arith.constant dense<0.000000e+00> : vector<8x128xf32>
    %16 = tpu.matmul %4, %14, %cst_17 {dimension_numbers = #tpu.dot_dimension_numbers<[1], [0], [0], [1], [0, 0, 1, 1], [], []>} : vector<8x64xf32>, vector<64x128xf32>, vector<8x128xf32> -> vector<8x128xf32>
    %c1_18 = arith.constant 1 : index
    %c0_19 = arith.constant 0 : index
    %c0_20 = arith.constant 0 : index
    %17 = vector.load %arg2[%c1_18, %c0_19, %c0_20] : memref<5x64x128xf32, #tpu.memory_space<vmem>>, vector<1x64x128xf32>
    %18 = vector.shape_cast %17 : vector<1x64x128xf32> to vector<64x128xf32>
    %cst_21 = arith.constant dense<0.000000e+00> : vector<8x128xf32>
    %19 = tpu.matmul %4, %18, %cst_21 {dimension_numbers = #tpu.dot_dimension_numbers<[1], [0], [0], [1], [0, 0, 1, 1], [], []>} : vector<8x64xf32>, vector<64x128xf32>, vector<8x128xf32> -> vector<8x128xf32>
    %20 = arith.addf %15, %19 : vector<8x128xf32>
    %cst_22 = arith.constant dense<0.000000e+00> : vector<8x128xf32>
    %21 = tpu.matmul %6, %18, %cst_22 {dimension_numbers = #tpu.dot_dimension_numbers<[1], [0], [0], [1], [0, 0, 1, 1], [], []>} : vector<8x64xf32>, vector<64x128xf32>, vector<8x128xf32> -> vector<8x128xf32>
    %22 = arith.addf %16, %21 : vector<8x128xf32>
    %c2_23 = arith.constant 2 : index
    %c0_24 = arith.constant 0 : index
    %c0_25 = arith.constant 0 : index
    %23 = vector.load %arg2[%c2_23, %c0_24, %c0_25] : memref<5x64x128xf32, #tpu.memory_space<vmem>>, vector<1x64x128xf32>
    %24 = vector.shape_cast %23 : vector<1x64x128xf32> to vector<64x128xf32>
    %cst_26 = arith.constant dense<0.000000e+00> : vector<8x128xf32>
    %25 = tpu.matmul %6, %24, %cst_26 {dimension_numbers = #tpu.dot_dimension_numbers<[1], [0], [0], [1], [0, 0, 1, 1], [], []>} : vector<8x64xf32>, vector<64x128xf32>, vector<8x128xf32> -> vector<8x128xf32>
    %26 = arith.addf %20, %25 : vector<8x128xf32>
    %cst_27 = arith.constant dense<0.000000e+00> : vector<8x128xf32>
    %27 = tpu.matmul %8, %24, %cst_27 {dimension_numbers = #tpu.dot_dimension_numbers<[1], [0], [0], [1], [0, 0, 1, 1], [], []>} : vector<8x64xf32>, vector<64x128xf32>, vector<8x128xf32> -> vector<8x128xf32>
    %28 = arith.addf %22, %27 : vector<8x128xf32>
    %c3_28 = arith.constant 3 : index
    %c0_29 = arith.constant 0 : index
    %c0_30 = arith.constant 0 : index
    %29 = vector.load %arg2[%c3_28, %c0_29, %c0_30] : memref<5x64x128xf32, #tpu.memory_space<vmem>>, vector<1x64x128xf32>
    %30 = vector.shape_cast %29 : vector<1x64x128xf32> to vector<64x128xf32>
    %cst_31 = arith.constant dense<0.000000e+00> : vector<8x128xf32>
    %31 = tpu.matmul %8, %30, %cst_31 {dimension_numbers = #tpu.dot_dimension_numbers<[1], [0], [0], [1], [0, 0, 1, 1], [], []>} : vector<8x64xf32>, vector<64x128xf32>, vector<8x128xf32> -> vector<8x128xf32>
    %32 = arith.addf %26, %31 : vector<8x128xf32>
    %cst_32 = arith.constant dense<0.000000e+00> : vector<8x128xf32>
    %33 = tpu.matmul %10, %30, %cst_32 {dimension_numbers = #tpu.dot_dimension_numbers<[1], [0], [0], [1], [0, 0, 1, 1], [], []>} : vector<8x64xf32>, vector<64x128xf32>, vector<8x128xf32> -> vector<8x128xf32>
    %34 = arith.addf %28, %33 : vector<8x128xf32>
    %c4_33 = arith.constant 4 : index
    %c0_34 = arith.constant 0 : index
    %c0_35 = arith.constant 0 : index
    %35 = vector.load %arg2[%c4_33, %c0_34, %c0_35] : memref<5x64x128xf32, #tpu.memory_space<vmem>>, vector<1x64x128xf32>
    %36 = vector.shape_cast %35 : vector<1x64x128xf32> to vector<64x128xf32>
    %cst_36 = arith.constant dense<0.000000e+00> : vector<8x128xf32>
    %37 = tpu.matmul %10, %36, %cst_36 {dimension_numbers = #tpu.dot_dimension_numbers<[1], [0], [0], [1], [0, 0, 1, 1], [], []>} : vector<8x64xf32>, vector<64x128xf32>, vector<8x128xf32> -> vector<8x128xf32>
    %38 = arith.addf %32, %37 : vector<8x128xf32>
    %cst_37 = arith.constant dense<0.000000e+00> : vector<8x128xf32>
    %39 = tpu.matmul %12, %36, %cst_37 {dimension_numbers = #tpu.dot_dimension_numbers<[1], [0], [0], [1], [0, 0, 1, 1], [], []>} : vector<8x64xf32>, vector<64x128xf32>, vector<8x128xf32> -> vector<8x128xf32>
    %40 = arith.addf %34, %39 : vector<8x128xf32>
    %41 = vector.extract_strided_slice %38 {offsets = [0, 0], sizes = [8, 64], strides = [1, 1]} : vector<8x128xf32> to vector<8x64xf32>
    %42 = vector.extract_strided_slice %38 {offsets = [0, 64], sizes = [8, 64], strides = [1, 1]} : vector<8x128xf32> to vector<8x64xf32>
    %43 = arith.maximumf %41, %42 : vector<8x64xf32>
    %44 = vector.extract_strided_slice %40 {offsets = [0, 0], sizes = [8, 64], strides = [1, 1]} : vector<8x128xf32> to vector<8x64xf32>
    %45 = vector.extract_strided_slice %40 {offsets = [0, 64], sizes = [8, 64], strides = [1, 1]} : vector<8x128xf32> to vector<8x64xf32>
    %46 = arith.maximumf %44, %45 : vector<8x64xf32>
    %47 = arith.maximumf %43, %46 : vector<8x64xf32>
    %48 = vector.broadcast %0 : vector<1x64xf32> to vector<8x64xf32>
    %49 = arith.addf %47, %48 : vector<8x64xf32>
    %cst_38 = arith.constant 0.000000e+00 : f32
    %50 = vector.broadcast %cst_38 : f32 to vector<8x64xf32>
    %51 = arith.maximumf %49, %50 : vector<8x64xf32>
    %cst_39 = arith.constant 0.000000e+00 : f32
    %52 = vector.broadcast %cst_39 : f32 to vector<1x2x64xf32>
    %c0_40 = arith.constant 0 : index
    %c0_41 = arith.constant 0 : index
    %c0_42 = arith.constant 0 : index
    %53 = vector.load %arg11[%c0_40, %c0_41, %c0_42] : memref<1x12x64xf32, #tpu.memory_space<vmem>>, vector<1x2x64xf32>
    tpu.vector_store %arg11[%c0_40, %c0_41, %c0_42], %52 {strides = array<i32>} : memref<1x12x64xf32, #tpu.memory_space<vmem>>, vector<1x2x64xf32>,
    %cst_43 = arith.constant 0.000000e+00 : f32
    %54 = vector.broadcast %cst_43 : f32 to vector<1x2x64xf32>
    %c0_44 = arith.constant 0 : index
    %c10 = arith.constant 10 : index
    %c0_45 = arith.constant 0 : index
    %55 = vector.load %arg11[%c0_44, %c10, %c0_45] : memref<1x12x64xf32, #tpu.memory_space<vmem>>, vector<1x2x64xf32>
    tpu.vector_store %arg11[%c0_44, %c10, %c0_45], %54 {strides = array<i32>} : memref<1x12x64xf32, #tpu.memory_space<vmem>>, vector<1x2x64xf32>,
    %56 = vector.shape_cast %51 : vector<8x64xf32> to vector<1x8x64xf32>
    %c0_46 = arith.constant 0 : index
    %c2_47 = arith.constant 2 : index
    %c0_48 = arith.constant 0 : index
    %57 = vector.load %arg11[%c0_46, %c2_47, %c0_48] : memref<1x12x64xf32, #tpu.memory_space<vmem>>, vector<1x8x64xf32>
    tpu.vector_store %arg11[%c0_46, %c2_47, %c0_48], %56 {strides = array<i32>} : memref<1x12x64xf32, #tpu.memory_space<vmem>>, vector<1x8x64xf32>,
    %c0_49 = arith.constant 0 : index
    %c0_50 = arith.constant 0 : index
    %58 = vector.load %arg5[%c0_49, %c0_50] : memref<1x64xf32, #tpu.memory_space<vmem>>, vector<1x64xf32>
    %c0_51 = arith.constant 0 : index
    %c0_52 = arith.constant 0 : index
    %c0_53 = arith.constant 0 : index
    %59 = tpu.strided_load %arg11[%c0_51, %c0_52, %c0_53] {strides = array<i32: 1, 2, 1>} : memref<1x12x64xf32, #tpu.memory_space<vmem>>, vector<1x4x64xf32>
    %60 = vector.shape_cast %59 : vector<1x4x64xf32> to vector<4x64xf32>
    %c0_54 = arith.constant 0 : index
    %c1_55 = arith.constant 1 : index
    %c0_56 = arith.constant 0 : index
    %61 = tpu.strided_load %arg11[%c0_54, %c1_55, %c0_56] {strides = array<i32: 1, 2, 1>} : memref<1x12x64xf32, #tpu.memory_space<vmem>>, vector<1x4x64xf32>
    %62 = vector.shape_cast %61 : vector<1x4x64xf32> to vector<4x64xf32>
    %c0_57 = arith.constant 0 : index
    %c2_58 = arith.constant 2 : index
    %c0_59 = arith.constant 0 : index
    %63 = tpu.strided_load %arg11[%c0_57, %c2_58, %c0_59] {strides = array<i32: 1, 2, 1>} : memref<1x12x64xf32, #tpu.memory_space<vmem>>, vector<1x4x64xf32>
    %64 = vector.shape_cast %63 : vector<1x4x64xf32> to vector<4x64xf32>
    %c0_60 = arith.constant 0 : index
    %c3_61 = arith.constant 3 : index
    %c0_62 = arith.constant 0 : index
    %65 = tpu.strided_load %arg11[%c0_60, %c3_61, %c0_62] {strides = array<i32: 1, 2, 1>} : memref<1x12x64xf32, #tpu.memory_space<vmem>>, vector<1x4x64xf32>
    %66 = vector.shape_cast %65 : vector<1x4x64xf32> to vector<4x64xf32>
    %c0_63 = arith.constant 0 : index
    %c4_64 = arith.constant 4 : index
    %c0_65 = arith.constant 0 : index
    %67 = tpu.strided_load %arg11[%c0_63, %c4_64, %c0_65] {strides = array<i32: 1, 2, 1>} : memref<1x12x64xf32, #tpu.memory_space<vmem>>, vector<1x4x64xf32>
    %68 = vector.shape_cast %67 : vector<1x4x64xf32> to vector<4x64xf32>
    %c0_66 = arith.constant 0 : index
    %c5_67 = arith.constant 5 : index
    %c0_68 = arith.constant 0 : index
    %69 = tpu.strided_load %arg11[%c0_66, %c5_67, %c0_68] {strides = array<i32: 1, 2, 1>} : memref<1x12x64xf32, #tpu.memory_space<vmem>>, vector<1x4x64xf32>
    %70 = vector.shape_cast %69 : vector<1x4x64xf32> to vector<4x64xf32>
    %c0_69 = arith.constant 0 : index
    %c0_70 = arith.constant 0 : index
    %c0_71 = arith.constant 0 : index
    %71 = vector.load %arg4[%c0_69, %c0_70, %c0_71] : memref<5x64x128xf32, #tpu.memory_space<vmem>>, vector<1x64x128xf32>
    %72 = vector.shape_cast %71 : vector<1x64x128xf32> to vector<64x128xf32>
    %cst_72 = arith.constant dense<0.000000e+00> : vector<4x128xf32>
    %73 = tpu.matmul %60, %72, %cst_72 {dimension_numbers = #tpu.dot_dimension_numbers<[1], [0], [0], [1], [0, 0, 1, 1], [], []>} : vector<4x64xf32>, vector<64x128xf32>, vector<4x128xf32> -> vector<4x128xf32>
    %cst_73 = arith.constant dense<0.000000e+00> : vector<4x128xf32>
    %74 = tpu.matmul %62, %72, %cst_73 {dimension_numbers = #tpu.dot_dimension_numbers<[1], [0], [0], [1], [0, 0, 1, 1], [], []>} : vector<4x64xf32>, vector<64x128xf32>, vector<4x128xf32> -> vector<4x128xf32>
    %c1_74 = arith.constant 1 : index
    %c0_75 = arith.constant 0 : index
    %c0_76 = arith.constant 0 : index
    %75 = vector.load %arg4[%c1_74, %c0_75, %c0_76] : memref<5x64x128xf32, #tpu.memory_space<vmem>>, vector<1x64x128xf32>
    %76 = vector.shape_cast %75 : vector<1x64x128xf32> to vector<64x128xf32>
    %cst_77 = arith.constant dense<0.000000e+00> : vector<4x128xf32>
    %77 = tpu.matmul %62, %76, %cst_77 {dimension_numbers = #tpu.dot_dimension_numbers<[1], [0], [0], [1], [0, 0, 1, 1], [], []>} : vector<4x64xf32>, vector<64x128xf32>, vector<4x128xf32> -> vector<4x128xf32>
    %78 = arith.addf %73, %77 : vector<4x128xf32>
    %cst_78 = arith.constant dense<0.000000e+00> : vector<4x128xf32>
    %79 = tpu.matmul %64, %76, %cst_78 {dimension_numbers = #tpu.dot_dimension_numbers<[1], [0], [0], [1], [0, 0, 1, 1], [], []>} : vector<4x64xf32>, vector<64x128xf32>, vector<4x128xf32> -> vector<4x128xf32>
    %80 = arith.addf %74, %79 : vector<4x128xf32>
    %c2_79 = arith.constant 2 : index
    %c0_80 = arith.constant 0 : index
    %c0_81 = arith.constant 0 : index
    %81 = vector.load %arg4[%c2_79, %c0_80, %c0_81] : memref<5x64x128xf32, #tpu.memory_space<vmem>>, vector<1x64x128xf32>
    %82 = vector.shape_cast %81 : vector<1x64x128xf32> to vector<64x128xf32>
    %cst_82 = arith.constant dense<0.000000e+00> : vector<4x128xf32>
    %83 = tpu.matmul %64, %82, %cst_82 {dimension_numbers = #tpu.dot_dimension_numbers<[1], [0], [0], [1], [0, 0, 1, 1], [], []>} : vector<4x64xf32>, vector<64x128xf32>, vector<4x128xf32> -> vector<4x128xf32>
    %84 = arith.addf %78, %83 : vector<4x128xf32>
    %cst_83 = arith.constant dense<0.000000e+00> : vector<4x128xf32>
    %85 = tpu.matmul %66, %82, %cst_83 {dimension_numbers = #tpu.dot_dimension_numbers<[1], [0], [0], [1], [0, 0, 1, 1], [], []>} : vector<4x64xf32>, vector<64x128xf32>, vector<4x128xf32> -> vector<4x128xf32>
    %86 = arith.addf %80, %85 : vector<4x128xf32>
    %c3_84 = arith.constant 3 : index
    %c0_85 = arith.constant 0 : index
    %c0_86 = arith.constant 0 : index
    %87 = vector.load %arg4[%c3_84, %c0_85, %c0_86] : memref<5x64x128xf32, #tpu.memory_space<vmem>>, vector<1x64x128xf32>
    %88 = vector.shape_cast %87 : vector<1x64x128xf32> to vector<64x128xf32>
    %cst_87 = arith.constant dense<0.000000e+00> : vector<4x128xf32>
    %89 = tpu.matmul %66, %88, %cst_87 {dimension_numbers = #tpu.dot_dimension_numbers<[1], [0], [0], [1], [0, 0, 1, 1], [], []>} : vector<4x64xf32>, vector<64x128xf32>, vector<4x128xf32> -> vector<4x128xf32>
    %90 = arith.addf %84, %89 : vector<4x128xf32>
    %cst_88 = arith.constant dense<0.000000e+00> : vector<4x128xf32>
    %91 = tpu.matmul %68, %88, %cst_88 {dimension_numbers = #tpu.dot_dimension_numbers<[1], [0], [0], [1], [0, 0, 1, 1], [], []>} : vector<4x64xf32>, vector<64x128xf32>, vector<4x128xf32> -> vector<4x128xf32>
    %92 = arith.addf %86, %91 : vector<4x128xf32>
    %c4_89 = arith.constant 4 : index
    %c0_90 = arith.constant 0 : index
    %c0_91 = arith.constant 0 : index
    %93 = vector.load %arg4[%c4_89, %c0_90, %c0_91] : memref<5x64x128xf32, #tpu.memory_space<vmem>>, vector<1x64x128xf32>
    %94 = vector.shape_cast %93 : vector<1x64x128xf32> to vector<64x128xf32>
    %cst_92 = arith.constant dense<0.000000e+00> : vector<4x128xf32>
    %95 = tpu.matmul %68, %94, %cst_92 {dimension_numbers = #tpu.dot_dimension_numbers<[1], [0], [0], [1], [0, 0, 1, 1], [], []>} : vector<4x64xf32>, vector<64x128xf32>, vector<4x128xf32> -> vector<4x128xf32>
    %96 = arith.addf %90, %95 : vector<4x128xf32>
    %cst_93 = arith.constant dense<0.000000e+00> : vector<4x128xf32>
    %97 = tpu.matmul %70, %94, %cst_93 {dimension_numbers = #tpu.dot_dimension_numbers<[1], [0], [0], [1], [0, 0, 1, 1], [], []>} : vector<4x64xf32>, vector<64x128xf32>, vector<4x128xf32> -> vector<4x128xf32>
    %98 = arith.addf %92, %97 : vector<4x128xf32>
    %99 = vector.extract_strided_slice %96 {offsets = [0, 0], sizes = [4, 64], strides = [1, 1]} : vector<4x128xf32> to vector<4x64xf32>
    %100 = vector.extract_strided_slice %96 {offsets = [0, 64], sizes = [4, 64], strides = [1, 1]} : vector<4x128xf32> to vector<4x64xf32>
    %101 = arith.maximumf %99, %100 : vector<4x64xf32>
    %102 = vector.extract_strided_slice %98 {offsets = [0, 0], sizes = [4, 64], strides = [1, 1]} : vector<4x128xf32> to vector<4x64xf32>
    %103 = vector.extract_strided_slice %98 {offsets = [0, 64], sizes = [4, 64], strides = [1, 1]} : vector<4x128xf32> to vector<4x64xf32>
    %104 = arith.maximumf %102, %103 : vector<4x64xf32>
    %105 = arith.maximumf %101, %104 : vector<4x64xf32>
    %106 = vector.broadcast %58 : vector<1x64xf32> to vector<4x64xf32>
    %107 = arith.addf %105, %106 : vector<4x64xf32>
    %cst_94 = arith.constant 0.000000e+00 : f32
    %108 = vector.broadcast %cst_94 : f32 to vector<4x64xf32>
    %109 = arith.maximumf %107, %108 : vector<4x64xf32>
    %110 = vector.shape_cast %109 : vector<4x64xf32> to vector<1x4x64xf32>
    %111 = vector.extract_strided_slice %110 {offsets = [0, 0, 0], sizes = [1, 1, 64], strides = [1, 1, 1]} : vector<1x4x64xf32> to vector<1x1x64xf32>
    %112 = vector.shape_cast %111 : vector<1x1x64xf32> to vector<1x64xf32>
    %c0_95 = arith.constant 0 : index
    %c0_96 = arith.constant 0 : index
    %113 = vector.load %arg6[%c0_95, %c0_96] : memref<256x32xf32, #tpu.memory_space<vmem>>, vector<64x32xf32>
    %cst_97 = arith.constant dense<0.000000e+00> : vector<1x32xf32>
    %114 = tpu.matmul %112, %113, %cst_97 {dimension_numbers = #tpu.dot_dimension_numbers<[1], [0], [0], [1], [0, 0, 1, 1], [], []>} : vector<1x64xf32>, vector<64x32xf32>, vector<1x32xf32> -> vector<1x32xf32>
    %c0_98 = arith.constant 0 : index
    %c0_99 = arith.constant 0 : index
    %115 = vector.load %arg7[%c0_98, %c0_99] : memref<1x32xf32, #tpu.memory_space<vmem>>, vector<1x32xf32>
    %116 = arith.addf %114, %115 : vector<1x32xf32>
    %117 = vector.extract_strided_slice %110 {offsets = [0, 1, 0], sizes = [1, 1, 64], strides = [1, 1, 1]} : vector<1x4x64xf32> to vector<1x1x64xf32>
    %118 = vector.shape_cast %117 : vector<1x1x64xf32> to vector<1x64xf32>
    %c64 = arith.constant 64 : index
    %c0_100 = arith.constant 0 : index
    %119 = vector.load %arg6[%c64, %c0_100] : memref<256x32xf32, #tpu.memory_space<vmem>>, vector<64x32xf32>
    %cst_101 = arith.constant dense<0.000000e+00> : vector<1x32xf32>
    %120 = tpu.matmul %118, %119, %cst_101 {dimension_numbers = #tpu.dot_dimension_numbers<[1], [0], [0], [1], [0, 0, 1, 1], [], []>} : vector<1x64xf32>, vector<64x32xf32>, vector<1x32xf32> -> vector<1x32xf32>
    %121 = arith.addf %116, %120 : vector<1x32xf32>
    %122 = vector.extract_strided_slice %110 {offsets = [0, 2, 0], sizes = [1, 1, 64], strides = [1, 1, 1]} : vector<1x4x64xf32> to vector<1x1x64xf32>
    %123 = vector.shape_cast %122 : vector<1x1x64xf32> to vector<1x64xf32>
    %c128 = arith.constant 128 : index
    %c0_102 = arith.constant 0 : index
    %124 = vector.load %arg6[%c128, %c0_102] : memref<256x32xf32, #tpu.memory_space<vmem>>, vector<64x32xf32>
    %cst_103 = arith.constant dense<0.000000e+00> : vector<1x32xf32>
    %125 = tpu.matmul %123, %124, %cst_103 {dimension_numbers = #tpu.dot_dimension_numbers<[1], [0], [0], [1], [0, 0, 1, 1], [], []>} : vector<1x64xf32>, vector<64x32xf32>, vector<1x32xf32> -> vector<1x32xf32>
    %126 = arith.addf %121, %125 : vector<1x32xf32>
    %127 = vector.extract_strided_slice %110 {offsets = [0, 3, 0], sizes = [1, 1, 64], strides = [1, 1, 1]} : vector<1x4x64xf32> to vector<1x1x64xf32>
    %128 = vector.shape_cast %127 : vector<1x1x64xf32> to vector<1x64xf32>
    %c192 = arith.constant 192 : index
    %c0_104 = arith.constant 0 : index
    %129 = vector.load %arg6[%c192, %c0_104] : memref<256x32xf32, #tpu.memory_space<vmem>>, vector<64x32xf32>
    %cst_105 = arith.constant dense<0.000000e+00> : vector<1x32xf32>
    %130 = tpu.matmul %128, %129, %cst_105 {dimension_numbers = #tpu.dot_dimension_numbers<[1], [0], [0], [1], [0, 0, 1, 1], [], []>} : vector<1x64xf32>, vector<64x32xf32>, vector<1x32xf32> -> vector<1x32xf32>
    %131 = arith.addf %126, %130 : vector<1x32xf32>
    %cst_106 = arith.constant 0.000000e+00 : f32
    %132 = vector.broadcast %cst_106 : f32 to vector<1x32xf32>
    %133 = arith.maximumf %131, %132 : vector<1x32xf32>
    %c0_107 = arith.constant 0 : index
    %c0_108 = arith.constant 0 : index
    %134 = vector.load %arg8[%c0_107, %c0_108] : memref<32x128xf32, #tpu.memory_space<vmem>>, vector<32x128xf32>
    %cst_109 = arith.constant dense<0.000000e+00> : vector<1x128xf32>
    %135 = tpu.matmul %133, %134, %cst_109 {dimension_numbers = #tpu.dot_dimension_numbers<[1], [0], [0], [1], [0, 0, 1, 1], [], []>} : vector<1x32xf32>, vector<32x128xf32>, vector<1x128xf32> -> vector<1x128xf32>
    %c0_110 = arith.constant 0 : index
    %c0_111 = arith.constant 0 : index
    %136 = vector.load %arg9[%c0_110, %c0_111] : memref<1x128xf32, #tpu.memory_space<vmem>>, vector<1x128xf32>
    %137 = arith.addf %135, %136 : vector<1x128xf32>
    %c0_112 = arith.constant 0 : index
    %c0_113 = arith.constant 0 : index
    %c0_114 = arith.constant 0 : index
    %138 = vector.load %arg10[%c0_112, %c0_113, %c0_114] : memref<1x1x128xf32, #tpu.memory_space<vmem>>, vector<1x1x128xf32>
    %139 = vector.shape_cast %138 : vector<1x1x128xf32> to vector<1x128xf32>
    %140 = vector.shape_cast %137 : vector<1x128xf32> to vector<1x1x128xf32>
    tpu.vector_store %arg10[%c0_112, %c0_113, %c0_114], %140 {strides = array<i32>} : memref<1x1x128xf32, #tpu.memory_space<vmem>>, vector<1x1x128xf32>,
    return
  }
  func.func @transform_0(%arg0: i32) -> (i32, i32, i32) {
    %c0_i32 = arith.constant 0 : i32
    %c0_i32_0 = arith.constant 0 : i32
    %c0_i32_1 = arith.constant 0 : i32
    return %arg0, %c0_i32, %c0_i32_0 : i32, i32, i32
  }
  func.func @transform_1(%arg0: i32) -> (i32, i32, i32) {
    %c0_i32 = arith.constant 0 : i32
    %c0_i32_0 = arith.constant 0 : i32
    %c0_i32_1 = arith.constant 0 : i32
    %c0_i32_2 = arith.constant 0 : i32
    return %c0_i32, %c0_i32_0, %c0_i32_1 : i32, i32, i32
  }
  func.func @transform_2(%arg0: i32) -> (i32, i32) {
    %c0_i32 = arith.constant 0 : i32
    %c0_i32_0 = arith.constant 0 : i32
    %c0_i32_1 = arith.constant 0 : i32
    return %c0_i32, %c0_i32_0 : i32, i32
  }
  func.func @transform_3(%arg0: i32) -> (i32, i32, i32) {
    %c0_i32 = arith.constant 0 : i32
    %c0_i32_0 = arith.constant 0 : i32
    %c0_i32_1 = arith.constant 0 : i32
    %c0_i32_2 = arith.constant 0 : i32
    return %c0_i32, %c0_i32_0, %c0_i32_1 : i32, i32, i32
  }
  func.func @transform_4(%arg0: i32) -> (i32, i32) {
    %c0_i32 = arith.constant 0 : i32
    %c0_i32_0 = arith.constant 0 : i32
    %c0_i32_1 = arith.constant 0 : i32
    return %c0_i32, %c0_i32_0 : i32, i32
  }
  func.func @transform_5(%arg0: i32) -> (i32, i32) {
    %c0_i32 = arith.constant 0 : i32
    %c0_i32_0 = arith.constant 0 : i32
    %c0_i32_1 = arith.constant 0 : i32
    return %c0_i32, %c0_i32_0 : i32, i32
  }
  func.func @transform_6(%arg0: i32) -> (i32, i32) {
    %c0_i32 = arith.constant 0 : i32
    %c0_i32_0 = arith.constant 0 : i32
    %c0_i32_1 = arith.constant 0 : i32
    return %c0_i32, %c0_i32_0 : i32, i32
  }
  func.func @transform_7(%arg0: i32) -> (i32, i32) {
    %c0_i32 = arith.constant 0 : i32
    %c0_i32_0 = arith.constant 0 : i32
    %c0_i32_1 = arith.constant 0 : i32
    return %c0_i32, %c0_i32_0 : i32, i32
  }
  func.func @transform_8(%arg0: i32) -> (i32, i32) {
    %c0_i32 = arith.constant 0 : i32
    %c0_i32_0 = arith.constant 0 : i32
    %c0_i32_1 = arith.constant 0 : i32
    return %c0_i32, %c0_i32_0 : i32, i32
  }
  func.func @transform_9(%arg0: i32) -> (i32, i32, i32) {
    %c0_i32 = arith.constant 0 : i32
    %c0_i32_0 = arith.constant 0 : i32
    %c0_i32_1 = arith.constant 0 : i32
    return %arg0, %c0_i32, %c0_i32_0 : i32, i32, i32
  }
}

</mosaic_0001>

<bundles_post_ra>
// kernel: conv_model_forward.1
= control target key start
LH: loop header
LB: loop body
LE: loop exit
PB: predicated region body
PF: predicated region fallthrough
CT: control target
= control target key end

     0   :  { %14 = vsyncpa [#allocation4], 0  ;;  %s4135_s0 = inlined_call_operand.vmem [shape: f32[2,20,64], index: 0, kind: input, shape index: {}]   ;;  %s4136_s1 = inlined_call_operand.vmem [shape: f32[5,64,128], index: 1, kind: input, shape index: {}]   ;;  %s4137_s2 = inlined_call_operand.vmem [shape: f32[1,64], index: 2, kind: input, shape index: {}]   ;;  %s4138_s3 = inlined_call_operand.vmem [shape: f32[5,64,128], index: 3, kind: input, shape index: {}]   ;;  %s4139_s4 = inlined_call_operand.vmem [shape: f32[1,64], index: 4, kind: input, shape index: {}]   ;;  %s4140_s5 = inlined_call_operand.vmem [shape: f32[256,32], index: 5, kind: input, shape index: {}]   ;;  %s4141_s6 = inlined_call_operand.vmem [shape: f32[1,32], index: 6, kind: input, shape index: {}]   ;;  %s4142_s7 = inlined_call_operand.vmem [shape: f32[32,128], index: 7, kind: input, shape index: {}]   ;;  %s4143_s8 = inlined_call_operand.vmem [shape: f32[1,128], index: 8, kind: input, shape index: {}]   ;;  %s4144_s9 = inlined_call_operand.hbm [shape: f32[2,1,128], index: 9, kind: output, shape index: {}]  }
   0x1   :  { %16 = vsyncpa [#allocation4 + $0x1], 0  ;;  %s3361_s30 = smov 0   ;;  %s3363_s10 = smov 0  }
   0x2   :  { %s3365_s11 = smov 0   ;;  %s3367_s12 = smov 0  }
   0x3 LB: > { %s3382_s13 = sadd.s32 4294967295, %s3305_s12   ;;  %s2410_s14 = sadd.s32 4294967294, %s3305_s12   ;;  %s3305_s12 = sphi %s3367_s12, %s4150_s12   ;;  %s3301_s11 = sphi %s3365_s11, %s4149_s11   ;;  %s3297_s10 = sphi %s3363_s10, %s4148_s10   ;;  %s3293_s30 = sphi %s3361_s30, %s4147_s30  }
   0x4   : > { %s3386_s15 = sadd.s32 1, %s3305_s12   ;;  %s223_s16 = sadd.s32 1, %s3301_s11 }
   0x5   : > { %s220_s17 = ssub.s32 %s3305_s12, %s3386_s15  ;;  %p233_p0 = scmp.ne.s32.totalorder %s3301_s11, %s3297_s10 }
   0x6   : > { %p221_p1 = scmp.eq.s32.totalorder %s220_s17, 0  ;;  %p234_p2 = scmp.eq.s32.totalorder %s3382_s13, 1 }
   0x7   : > { %p239_p3 = scmp.ne.s32.totalorder %s3297_s10, %s3293_s30  ;;  %p240_p4 = scmp.eq.s32.totalorder %s2410_s14, 1 }
   0x8   : > { %s3397_s18 = scalar_select %p221_p1, %s3301_s11, %s223_s16  }
   0x9   : > { %p3399_p5 = por %p234_p2, %p233_p0  ;;  %p3403_p6 = por %p240_p4, %p239_p3 }
   0xa   : > { %p2413_p7 = scmp.ge.s32.totalorder %s3305_s12, 1  ;;  %p290_p8 = scmp.lt.s32.totalorder %s3305_s12, 3 }
   0xc   : > { %p291_p9 = pnand %p2413_p7, %p290_p8 }
   0xd   : > { %p325_p10 = scmp.lt.s32.totalorder (!%p291_p9), %s3382_s13, 1  ;;  %s323_s24 = sand.u32 (!%p291_p9), 1, %s3297_s10  }
   0xe   : > { %294 = sbr.rel (%p291_p9) target bundleno = 1255 (0x4e7), region = 56  ;;  %s2511_s27 = sshll.u32 (!%p291_p9), %s3382_s13, 4 }
   0xf   : > { %s324_s28 = scalar_lea.vmem (!%p291_p9), [#allocation3], %s323_s24  ;;  %s4100_s23 = scalar_lea.hbm (!%p291_p9), %s4144_s9, %s2511_s27 }
  0x10   : > { %s2355_s16 = sshll.u32 (!%p291_p9), %s324_s28, 4  ;;  %s2356_s16 = int_to_ptr.vmem [resolvable:$true] %s2355_s16 }
  0x13   : > { %v3412_v0 = vld [vmem:[%s4136_s1 + $0x78] sm:$0xff]  ;;  %v3307_v2 = vmov 0.0   ;;  %v2426_v3 = vld [vmem:[%s4136_s1 + $0x70] sm:$0xff]  ;;  %v2425_v5 = vld [vmem:[%s4136_s1 + $0x68] sm:$0xff]  ;;  %s326_s21 = scalar_select %p325_p10, %s3382_s13, 1  ;;  %vm359_vm0 = vcmask 523264  }
  0x14   : > { %v349_v1 = vld [vmem:[%s4136_s1 + $0x38] sm:$0xff]  ;;  %2735 = vmatprep.subr.mxu0 %v3307_v2  ;;  %2754 = vmatprep.subr.mxu1 %v3307_v2  ;;  %v348_v4 = vld [vmem:[%s4136_s1 + $0x30] sm:$0xff]  ;;  %v347_v6 = vld [vmem:[%s4136_s1 + $0x28] sm:$0xff]  ;;  %vm3308_vm1 = vmmov 0   ;;  %vm1130_vm2 = vcmask 517120   ;;  %vm2267_vm3 = vcmask 261120  }
  0x15   : > { %2736 = vmatpush3.msra.mxu0 %v3412_v0  ;;  %2755 = vmatpush3.msra.mxu1 %v349_v1  ;;  %v2424_v7 = vld [vmem:[%s4136_s1 + $0x60] sm:$0xff]  ;;  %v2423_v9 = vld [vmem:[%s4136_s1 + $0x58] sm:$0xff]  ;;  %s3202_s14 = smul.u32 24, %s326_s21  ;;  %v2422_v11 = vld [vmem:[%s4136_s1 + $0x50] sm:$0xff]  ;;  %1131 = vst.msk [vmem:[#allocation2] sm:$0x3] %vm1130_vm2, %v3307_v2 }
  0x16   : > { %2737 = vmatprep.subr.mxu0 %v3307_v2  ;;  %2756 = vmatprep.subr.mxu1 %v3307_v2  ;;  %v346_v8 = vld [vmem:[%s4136_s1 + $0x20] sm:$0xff]  ;;  %v345_v10 = vld [vmem:[%s4136_s1 + $0x18] sm:$0xff]  ;;  %v344_v12 = vld [vmem:[%s4136_s1 + $0x10] sm:$0xff]  ;;  %1132 = vst.msk [vmem:[#allocation2 + $0xa] sm:$0x3] %vm1130_vm2, %v3307_v2  ;;  %s3310_s21 = smov [#allocation3]  }
  0x17   : > { %2738 = vmatpush3.msra.mxu0 %v2426_v3  ;;  %2757 = vmatpush3.msra.mxu1 %v348_v4  ;;  %v2421_v13 = vld [vmem:[%s4136_s1 + $0x48] sm:$0xff]  ;;  %s3471_s29 = scalar_lea.vmem %s4135_s0, %s3202_s14  ;;  %v2420_v15 = vld [vmem:[%s4136_s1 + $0x40] sm:$0xff]  ;;  %v2439_v20 = vld [vmem:[%s4136_s1 + $0xb8] sm:$0xff]  ;;  %s3245_s14 = scalar_lea.vmem %s2356_s16, 16 }
  0x18   : > { %2739 = vmatprep.subr.mxu0 %v3307_v2  ;;  %2758 = vmatprep.subr.mxu1 %v3307_v2  ;;  %v343_v14 = vld [vmem:[%s4136_s1 + $0x8] sm:$0xff]  ;;  %v342_v16 = vld [vmem:[%s4136_s1] sm:$0xff]  ;;  %v2438_v21 = vld [vmem:[%s4136_s1 + $0xb0] sm:$0xff]  ;;  %p3246_p11 = scmp.ne.s32.totalorder %s2356_s16, %s3245_s14  ;;  %s3249_s13 = sshll.u32 %s3310_s21, 4  ;;  %s3250_s13 = int_to_ptr.vmem [resolvable:$false] %s3249_s13 }
  0x19   : > { %2740 = vmatpush3.msra.mxu0 %v2425_v5  ;;  %2759 = vmatpush3.msra.mxu1 %v347_v6  ;;  %v2415_v17 = vld [vmem:[%s3471_s29 + $0x1] ss:$2 sm:$0xff]  ;;  %v331_v18 = vld [vmem:[%s3471_s29] ss:$2 sm:$0xff]  ;;  %v2435_v24 = vld [vmem:[%s4136_s1 + $0x98] sm:$0xff]  ;;  %s3251_s25 = scalar_lea.vmem %s3250_s13, 32  ;;  %p3252_p0 = scmp.lt.s32.totalorder %s2356_s16, %s3250_s13 }
  0x1a   : > { %2741 = vmatprep.subr.mxu0 %v3307_v2  ;;  %2760 = vmatprep.subr.mxu1 %v3307_v2  ;;  %v2416_v19 = vld [vmem:[%s3471_s29 + $0x2] ss:$2 sm:$0xff]  ;;  %v2417_v28 = vld [vmem:[%s3471_s29 + $0x3] ss:$2 sm:$0xff]  ;;  %v2449_v29 = vld [vmem:[%s4136_s1 + $0xf8] sm:$0xff]  ;;  %p3247_p12 = pnand %p3246_p11, %p3399_p5  ;;  %p3253_p1 = scmp.lt.s32.totalorder %s3251_s25, %s3245_s14 }
  0x1b   : > { %2742 = vmatpush3.msra.mxu0 %v2424_v7  ;;  %2761 = vmatpush3.msra.mxu1 %v346_v8  ;;  %v2437_v22 = vld [vmem:[%s4136_s1 + $0xa8] sm:$0xff]  ;;  %v2436_v23 = vld [vmem:[%s4136_s1 + $0xa0] sm:$0xff]  ;;  %v2434_v25 = vld [vmem:[%s4136_s1 + $0x90] sm:$0xff] }
  0x1c   : > { %2743 = vmatprep.subr.mxu0 %v3307_v2  ;;  %2762 = vmatprep.subr.mxu1 %v3307_v2  ;;  %v2433_v26 = vld [vmem:[%s4136_s1 + $0x88] sm:$0xff]  ;;  %v2432_v27 = vld [vmem:[%s4136_s1 + $0x80] sm:$0xff]  ;;  %v2448_v30 = vld [vmem:[%s4136_s1 + $0xf0] sm:$0xff]  ;;  %p3248_p13 = pneg %p3247_p12  ;;  %p3254_p2 = por %p3253_p1, %p3252_p0 }
  0x1d   : > { %2744 = vmatpush3.msra.mxu0 %v2423_v9  ;;  %2763 = vmatpush3.msra.mxu1 %v345_v10  ;;  %v2447_v31 = vld [vmem:[%s4136_s1 + $0xe8] sm:$0xff]  ;;  %v2446_v32 = vld [vmem:[%s4136_s1 + $0xe0] sm:$0xff]  ;;  %v2445_v33 = vld [vmem:[%s4136_s1 + $0xd8] sm:$0xff] }
  0x1e   : > { %2745 = vmatprep.subr.mxu0 %v3307_v2  ;;  %2764 = vmatprep.subr.mxu1 %v3307_v2  ;;  %v2444_v34 = vld [vmem:[%s4136_s1 + $0xd0] sm:$0xff]  ;;  %v2443_v35 = vld [vmem:[%s4136_s1 + $0xc8] sm:$0xff]  ;;  %v2442_v36 = vld [vmem:[%s4136_s1 + $0xc0] sm:$0xff]  ;;  %p3255_p3 = pnand %p3254_p2, %p3248_p13 }
  0x1f   : > { %2746 = vmatpush3.msra.mxu0 %v2422_v11  ;;  %2765 = vmatpush3.msra.mxu1 %v344_v12  ;;  %v2418_v37 = vld [vmem:[%s3471_s29 + $0x4] ss:$2 sm:$0xff]  ;;  %v2459_v38 = vld [vmem:[%s4136_s1 + $0x138] sm:$0xff]  ;;  %v2419_v46 = vld [vmem:[%s3471_s29 + $0x5] ss:$2 sm:$0xff]  ;;  %s3309_s29 = smov 64  }
  0x20   : > { %2747 = vmatprep.subr.mxu0 %v3307_v2  ;;  %2766 = vmatprep.subr.mxu1 %v3307_v2  ;;  %v2458_v39 = vld [vmem:[%s4136_s1 + $0x130] sm:$0xff]  ;;  %v2457_v40 = vld [vmem:[%s4136_s1 + $0x128] sm:$0xff]  ;;  %v2456_v41 = vld [vmem:[%s4136_s1 + $0x120] sm:$0xff] }
  0x21   : > { %2748 = vmatpush3.msra.mxu0 %v2421_v13  ;;  %2767 = vmatpush3.msra.mxu1 %v343_v14  ;;  %v2455_v42 = vld [vmem:[%s4136_s1 + $0x118] sm:$0xff]  ;;  %v2454_v43 = vld [vmem:[%s4136_s1 + $0x110] sm:$0xff]  ;;  %v2453_v44 = vld [vmem:[%s4136_s1 + $0x108] sm:$0xff] }
  0x22   : > { %2749 = vmatprep.subr.mxu0 %v3307_v2  ;;  %2768 = vmatprep.subr.mxu1 %v3307_v2  ;;  %v2452_v45 = vld [vmem:[%s4136_s1 + $0x100] sm:$0xff] }
  0x23   : > { %2750 = vmatpush3.msra.mxu0 %v2420_v15  ;;  %2751 = vmatprep.mubr.msk.f32.mxu0 %vm3308_vm1, %v3307_v2 }
  0x24   : > { %2769 = vmatpush3.msra.mxu1 %v342_v16  ;;  %2752 = vmatmul.mubr.msk.f32.vlgmr.msra.gmra.mxu0 %vm359_vm0, %v2415_v17 }
  0x25   : > { %2770 = vmatprep.mubr.msk.f32.mxu1 %vm3308_vm1, %v3307_v2  ;;  %2773 = vmatprep.subr.mxu0 %v3307_v2 }
  0x26   : > { %2792 = vmatprep.subr.mxu1 %v3307_v2  ;;  %2771 = vmatmul.mubr.msk.f32.vlgmr.msra.gmra.mxu1 %vm359_vm0, %v331_v18 }
  0x27   : > { %2774 = vmatpush3.msra.mxu0 %v3412_v0  ;;  %2793 = vmatpush3.msra.mxu1 %v349_v1  ;;  %v3665_v0 = vld [vmem:[%s4138_s3 + $0x78] sm:$0xff] }
  0x28   : > { %2775 = vmatprep.subr.mxu0 %v3307_v2  ;;  %2794 = vmatprep.subr.mxu1 %v3307_v2  ;;  %v3670_v1 = vld [vmem:[%s4138_s3 + $0x38] sm:$0xff] }
  0x29   : > { %2776 = vmatpush3.msra.mxu0 %v2426_v3  ;;  %2795 = vmatpush3.msra.mxu1 %v348_v4  ;;  %v3679_v3 = vld [vmem:[%s4138_s3 + $0x70] sm:$0xff] }
  0x2a   : > { %2777 = vmatprep.subr.mxu0 %v3307_v2  ;;  %2796 = vmatprep.subr.mxu1 %v3307_v2  ;;  %v3684_v4 = vld [vmem:[%s4138_s3 + $0x30] sm:$0xff] }
  0x2b   : > { %2778 = vmatpush3.msra.mxu0 %v2425_v5  ;;  %2797 = vmatpush3.msra.mxu1 %v347_v6  ;;  %v3693_v6 = vld [vmem:[%s4138_s3 + $0x68] sm:$0xff] }
  0x2c   : > { %2779 = vmatprep.subr.mxu0 %v3307_v2  ;;  %2798 = vmatprep.subr.mxu1 %v3307_v2 }
  0x2d   : > { %2780 = vmatpush3.msra.mxu0 %v2424_v7  ;;  %2799 = vmatpush3.msra.mxu1 %v346_v8  ;;  %v3698_v7 = vld [vmem:[%s4138_s3 + $0x28] sm:$0xff] }
  0x2e   : > { %2781 = vmatprep.subr.mxu0 %v3307_v2  ;;  %2800 = vmatprep.subr.mxu1 %v3307_v2 }
  0x2f   : > { %2782 = vmatpush3.msra.mxu0 %v2423_v9  ;;  %2801 = vmatpush3.msra.mxu1 %v345_v10  ;;  %v3707_v10 = vld [vmem:[%s4138_s3 + $0x60] sm:$0xff] }
  0x30   : > { %2783 = vmatprep.subr.mxu0 %v3307_v2  ;;  %2802 = vmatprep.subr.mxu1 %v3307_v2 }
  0x31   : > { %2784 = vmatpush3.msra.mxu0 %v2422_v11  ;;  %2803 = vmatpush3.msra.mxu1 %v344_v12  ;;  %v3712_v11 = vld [vmem:[%s4138_s3 + $0x20] sm:$0xff] }
  0x32   : > { %2785 = vmatprep.subr.mxu0 %v3307_v2  ;;  %2804 = vmatprep.subr.mxu1 %v3307_v2 }
  0x33   : > { %2786 = vmatpush3.msra.mxu0 %v2421_v13  ;;  %2805 = vmatpush3.msra.mxu1 %v343_v14 }
  0x34   : > { %2787 = vmatprep.subr.mxu0 %v3307_v2  ;;  %2806 = vmatprep.subr.mxu1 %v3307_v2 }
  0x35   : > { %2788 = vmatpush3.msra.mxu0 %v2420_v15  ;;  %2789 = vmatprep.mubr.msk.f32.mxu0 %vm3308_vm1, %v3307_v2 }
  0x36   : > { %2807 = vmatpush3.msra.mxu1 %v342_v16  ;;  %2790 = vmatmul.mubr.msk.f32.vlgmr.msra.gmra.mxu0 %vm359_vm0, %v2416_v19  ;;  %v2466_v16 = vld [vmem:[%s4138_s3 + $0x58] sm:$0xff] }
  0x37   : > { %2808 = vmatprep.mubr.msk.f32.mxu1 %vm3308_vm1, %v3307_v2  ;;  %2811 = vmatprep.subr.mxu0 %v3307_v2 }
  0x38   : > { %2830 = vmatprep.subr.mxu1 %v3307_v2  ;;  %2809 = vmatmul.mubr.msk.f32.vlgmr.msra.gmra.mxu1 %vm359_vm0, %v2415_v17  ;;  %v1149_v17 = vld [vmem:[%s4138_s3 + $0x18] sm:$0xff] }
  0x39   : > { %2812 = vmatpush3.msra.mxu0 %v2439_v20  ;;  %2831 = vmatpush3.msra.mxu1 %v2439_v20  ;;  %v2465_v20 = vld [vmem:[%s4138_s3 + $0x50] sm:$0xff] }
  0x3a   : > { %2813 = vmatprep.subr.mxu0 %v3307_v2  ;;  %2832 = vmatprep.subr.mxu1 %v3307_v2 }
  0x3b   : > { %2814 = vmatpush3.msra.mxu0 %v2438_v21  ;;  %2833 = vmatpush3.msra.mxu1 %v2438_v21  ;;  %v1148_v21 = vld [vmem:[%s4138_s3 + $0x10] sm:$0xff] }
  0x3c   : > { %2815 = vmatprep.subr.mxu0 %v3307_v2  ;;  %2834 = vmatprep.subr.mxu1 %v3307_v2 }
  0x3d   : > { %2816 = vmatpush3.msra.mxu0 %v2437_v22  ;;  %2835 = vmatpush3.msra.mxu1 %v2437_v22 }
  0x3e   : > { %2817 = vmatprep.subr.mxu0 %v3307_v2  ;;  %2836 = vmatprep.subr.mxu1 %v3307_v2 }
  0x3f   : > { %2818 = vmatpush3.msra.mxu0 %v2436_v23  ;;  %2837 = vmatpush3.msra.mxu1 %v2436_v23  ;;  %v2464_v23 = vld [vmem:[%s4138_s3 + $0x48] sm:$0xff] }
  0x40   : > { %2819 = vmatprep.subr.mxu0 %v3307_v2  ;;  %2838 = vmatprep.subr.mxu1 %v3307_v2 }
  0x41   : > { %2820 = vmatpush3.msra.mxu0 %v2435_v24  ;;  %2839 = vmatpush3.msra.mxu1 %v2435_v24  ;;  %v1147_v24 = vld [vmem:[%s4138_s3 + $0x8] sm:$0xff] }
  0x42   : > { %2821 = vmatprep.subr.mxu0 %v3307_v2  ;;  %2840 = vmatprep.subr.mxu1 %v3307_v2 }
  0x43   : > { %2822 = vmatpush3.msra.mxu0 %v2434_v25  ;;  %2841 = vmatpush3.msra.mxu1 %v2434_v25 }
  0x44   : > { %2823 = vmatprep.subr.mxu0 %v3307_v2  ;;  %2842 = vmatprep.subr.mxu1 %v3307_v2 }
  0x45   : > { %2824 = vmatpush3.msra.mxu0 %v2433_v26  ;;  %2843 = vmatpush3.msra.mxu1 %v2433_v26  ;;  %v2463_v26 = vld [vmem:[%s4138_s3 + $0x40] sm:$0xff] }
  0x46   : > { %2825 = vmatprep.subr.mxu0 %v3307_v2  ;;  %2844 = vmatprep.subr.mxu1 %v3307_v2 }
  0x47   : > { %2826 = vmatpush3.msra.mxu0 %v2432_v27  ;;  %2827 = vmatprep.mubr.msk.f32.mxu0 %vm3308_vm1, %v3307_v2 }
  0x48   : > { %2845 = vmatpush3.msra.mxu1 %v2432_v27  ;;  %2846 = vmatprep.mubr.msk.f32.mxu1 %vm3308_vm1, %v3307_v2  ;;  %v1146_v27 = vld [vmem:[%s4138_s3] sm:$0xff] }
  0x49   : > { %2828 = vmatmul.mubr.msk.f32.vlgmr.msra.gmra.mxu0 %vm359_vm0, %v2416_v19  ;;  %2847 = vmatmul.mubr.msk.f32.vlgmr.msra.gmra.mxu1 %vm359_vm0, %v2417_v28 }
  0x4a   : > { %2849 = vmatprep.subr.mxu0 %v3307_v2  ;;  %2868 = vmatprep.subr.mxu1 %v3307_v2 }
  0x4b   : > { %2850 = vmatpush3.msra.mxu0 %v2449_v29  ;;  %2869 = vmatpush3.msra.mxu1 %v2449_v29 }
  0x4c   : > { %2851 = vmatprep.subr.mxu0 %v3307_v2  ;;  %2870 = vmatprep.subr.mxu1 %v3307_v2 }
  0x4d   : > { %2852 = vmatpush3.msra.mxu0 %v2448_v30  ;;  %2871 = vmatpush3.msra.mxu1 %v2448_v30 }
  0x4e   : > { %2853 = vmatprep.subr.mxu0 %v3307_v2  ;;  %2872 = vmatprep.subr.mxu1 %v3307_v2 }
  0x4f   : > { %2854 = vmatpush3.msra.mxu0 %v2447_v31  ;;  %2873 = vmatpush3.msra.mxu1 %v2447_v31 }
  0x50   : > { %2855 = vmatprep.subr.mxu0 %v3307_v2  ;;  %2874 = vmatprep.subr.mxu1 %v3307_v2 }
  0x51   : > { %2856 = vmatpush3.msra.mxu0 %v2446_v32  ;;  %2875 = vmatpush3.msra.mxu1 %v2446_v32  ;;  %v2462_v32 = vld [vmem:[%s4137_s2] ss:$0 sm:$0xff] }
  0x52   : > { %2857 = vmatprep.subr.mxu0 %v3307_v2  ;;  %2876 = vmatprep.subr.mxu1 %v3307_v2 }
  0x53   : > { %2858 = vmatpush3.msra.mxu0 %v2445_v33  ;;  %2877 = vmatpush3.msra.mxu1 %v2445_v33 }
  0x54   : > { %2859 = vmatprep.subr.mxu0 %v3307_v2  ;;  %2878 = vmatprep.subr.mxu1 %v3307_v2 }
  0x55   : > { %2860 = vmatpush3.msra.mxu0 %v2444_v34  ;;  %2879 = vmatpush3.msra.mxu1 %v2444_v34 }
  0x56   : > { %2861 = vmatprep.subr.mxu0 %v3307_v2  ;;  %2880 = vmatprep.subr.mxu1 %v3307_v2 }
  0x57   : > { %2862 = vmatpush3.msra.mxu0 %v2443_v35  ;;  %2881 = vmatpush3.msra.mxu1 %v2443_v35 }
  0x58   : > { %2863 = vmatprep.subr.mxu0 %v3307_v2  ;;  %2882 = vmatprep.subr.mxu1 %v3307_v2 }
  0x59   : > { %2864 = vmatpush3.msra.mxu0 %v2442_v36  ;;  %2865 = vmatprep.mubr.msk.f32.mxu0 %vm3308_vm1, %v3307_v2 }
  0x5a   : > { %2883 = vmatpush3.msra.mxu1 %v2442_v36  ;;  %2884 = vmatprep.mubr.msk.f32.mxu1 %vm3308_vm1, %v3307_v2 }
  0x5b   : > { %2866 = vmatmul.mubr.msk.f32.vlgmr.msra.gmra.mxu0 %vm359_vm0, %v2417_v28  ;;  %2885 = vmatmul.mubr.msk.f32.vlgmr.msra.gmra.mxu1 %vm359_vm0, %v2418_v37 }
  0x5c   : > { %2887 = vmatprep.subr.mxu0 %v3307_v2  ;;  %2906 = vmatprep.subr.mxu1 %v3307_v2 }
  0x5d   : > { %2888 = vmatpush3.msra.mxu0 %v2459_v38  ;;  %2907 = vmatpush3.msra.mxu1 %v2459_v38 }
  0x5e   : > { %2889 = vmatprep.subr.mxu0 %v3307_v2  ;;  %2908 = vmatprep.subr.mxu1 %v3307_v2 }
  0x5f   : > { %2890 = vmatpush3.msra.mxu0 %v2458_v39  ;;  %2909 = vmatpush3.msra.mxu1 %v2458_v39  ;;  %v2482_v39 = vld [vmem:[%s4138_s3 + $0xb8] sm:$0xff] }
  0x60   : > { %2891 = vmatprep.subr.mxu0 %v3307_v2  ;;  %2910 = vmatprep.subr.mxu1 %v3307_v2 }
  0x61   : > { %2892 = vmatpush3.msra.mxu0 %v2457_v40  ;;  %2911 = vmatpush3.msra.mxu1 %v2457_v40  ;;  %v2481_v40 = vld [vmem:[%s4138_s3 + $0xb0] sm:$0xff] }
  0x62   : > { %2893 = vmatprep.subr.mxu0 %v3307_v2  ;;  %2912 = vmatprep.subr.mxu1 %v3307_v2 }
  0x63   : > { %2894 = vmatpush3.msra.mxu0 %v2456_v41  ;;  %2913 = vmatpush3.msra.mxu1 %v2456_v41  ;;  %v2480_v41 = vld [vmem:[%s4138_s3 + $0xa8] sm:$0xff] }
  0x64   : > { %2895 = vmatprep.subr.mxu0 %v3307_v2  ;;  %2914 = vmatprep.subr.mxu1 %v3307_v2 }
  0x65   : > { %2896 = vmatpush3.msra.mxu0 %v2455_v42  ;;  %2915 = vmatpush3.msra.mxu1 %v2455_v42  ;;  %v2479_v42 = vld [vmem:[%s4138_s3 + $0xa0] sm:$0xff] }
  0x66   : > { %2897 = vmatprep.subr.mxu0 %v3307_v2  ;;  %2916 = vmatprep.subr.mxu1 %v3307_v2 }
  0x67   : > { %2898 = vmatpush3.msra.mxu0 %v2454_v43  ;;  %2917 = vmatpush3.msra.mxu1 %v2454_v43  ;;  %v2478_v43 = vld [vmem:[%s4138_s3 + $0x98] sm:$0xff] }
  0x68   : > { %2899 = vmatprep.subr.mxu0 %v3307_v2  ;;  %2918 = vmatprep.subr.mxu1 %v3307_v2 }
  0x69   : > { %2900 = vmatpush3.msra.mxu0 %v2453_v44  ;;  %2919 = vmatpush3.msra.mxu1 %v2453_v44  ;;  %v2477_v44 = vld [vmem:[%s4138_s3 + $0x90] sm:$0xff] }
  0x6a   : > { %2901 = vmatprep.subr.mxu0 %v3307_v2  ;;  %2920 = vmatprep.subr.mxu1 %v3307_v2 }
  0x6b   : > { %2902 = vmatpush3.msra.mxu0 %v2452_v45  ;;  %2903 = vmatprep.mubr.msk.f32.mxu0 %vm3308_vm1, %v3307_v2 }
  0x6c   : > { %2921 = vmatpush3.msra.mxu1 %v2452_v45  ;;  %2922 = vmatprep.mubr.msk.f32.mxu1 %vm3308_vm1, %v3307_v2  ;;  %v2476_v45 = vld [vmem:[%s4138_s3 + $0x88] sm:$0xff] }
  0x6d   : > { %2904 = vmatmul.mubr.msk.f32.vlgmr.msra.gmra.mxu0 %vm359_vm0, %v2418_v37  ;;  %2923 = vmatmul.mubr.msk.f32.vlgmr.msra.gmra.mxu1 %vm359_vm0, %v2419_v46  ;;  %v2475_v46 = vld [vmem:[%s4138_s3 + $0x80] sm:$0xff] }
  0x6e   : > { %2925 = vmatprep.subr.mxu0 %v3307_v2  ;;  %2944 = vmatprep.subr.mxu1 %v3307_v2 }
  0x6f   : > { %2941 = vmatprep.mubr.msk.f32.mxu0 %vm3308_vm1, %v3307_v2  ;;  %2960 = vmatprep.mubr.msk.f32.mxu1 %vm3308_vm1, %v3307_v2 }
  0x70   : > { %2926 = vmatpush3.msra.mxu0 %v3665_v0  ;;  %2945 = vmatpush3.msra.mxu1 %v3670_v1 }
  0x71   : > { %2927 = vmatprep.subr.mxu0 %v3307_v2  ;;  %2946 = vmatprep.subr.mxu1 %v3307_v2 }
  0x72   : > { %2928 = vmatpush3.msra.mxu0 %v3679_v3  ;;  %2947 = vmatpush3.msra.mxu1 %v3684_v4 }
  0x73   : > { %2929 = vmatprep.subr.mxu0 %v3307_v2  ;;  %2948 = vmatprep.subr.mxu1 %v3307_v2 }
  0x74   : > { %2930 = vmatpush3.msra.mxu0 %v3693_v6  ;;  %2949 = vmatpush3.msra.mxu1 %v3698_v7 }
  0x75   : > { %2931 = vmatprep.subr.mxu0 %v3307_v2  ;;  %2950 = vmatprep.subr.mxu1 %v3307_v2 }
  0x76   : > { %2932 = vmatpush3.msra.mxu0 %v3707_v10  ;;  %2951 = vmatpush3.msra.mxu1 %v3712_v11 }
  0x77   : > { %2933 = vmatprep.subr.mxu0 %v3307_v2  ;;  %2952 = vmatprep.subr.mxu1 %v3307_v2 }
  0x78   : > { %2934 = vmatpush3.msra.mxu0 %v2466_v16  ;;  %2953 = vmatpush3.msra.mxu1 %v1149_v17 }
  0x79   : > { %2935 = vmatprep.subr.mxu0 %v3307_v2  ;;  %2954 = vmatprep.subr.mxu1 %v3307_v2 }
  0x7a   : > { %2936 = vmatpush3.msra.mxu0 %v2465_v20  ;;  %2955 = vmatpush3.msra.mxu1 %v1148_v21 }
  0x7b   : > { %2937 = vmatprep.subr.mxu0 %v3307_v2  ;;  %2956 = vmatprep.subr.mxu1 %v3307_v2 }
  0x7c   : > { %2938 = vmatpush3.msra.mxu0 %v2464_v23  ;;  %2957 = vmatpush3.msra.mxu1 %v1147_v24 }
  0x7d   : > { %2939 = vmatprep.subr.mxu0 %v3307_v2  ;;  %2958 = vmatprep.subr.mxu1 %v3307_v2 }
  0x7e   : > { %2940 = vmatpush3.msra.mxu0 %v2463_v26  ;;  %2959 = vmatpush3.msra.mxu1 %v1146_v27 }
  0x7f   : > { %2963 = vmatprep.subr.mxu0 %v3307_v2  ;;  %2982 = vmatprep.subr.mxu1 %v3307_v2 }
  0xe4   : > { %v429_v47 = vpop.f32.mrf.mxu0 }
  0xe6   : > { %v502_v48 = vpop.f32.mrf.mxu1  ;;  %v2753_v49 = vpop.f32.mrf.mxu0 }
  0xe7   : > { %v503_v50 = vadd.f32 %v502_v48, %v429_v47  ;;  %v2492_v48 = vld [vmem:[%s4138_s3 + $0xf8] sm:$0xff]  ;;  %v2491_v49 = vld [vmem:[%s4138_s3 + $0xf0] sm:$0xff] }
  0xe8   : > { %v2772_v51 = vpop.f32.mrf.mxu1 }
  0xe9   : > { %v2489_v51 = vld [vmem:[%s4138_s3 + $0xe0] sm:$0xff] }
  0xf6   : > { %v575_v52 = vpop.f32.mrf.mxu0 }
  0xf8   : > { %v645_v53 = vpop.f32.mrf.mxu1  ;;  %v2791_v54 = vpop.f32.mrf.mxu0 }
  0xf9   : > { %v646_v8 = vadd.f32 %v645_v53, %v575_v52  ;;  %v2488_v52 = vld [vmem:[%s4138_s3 + $0xd8] sm:$0xff]  ;;  %v2487_v53 = vld [vmem:[%s4138_s3 + $0xd0] sm:$0xff]  ;;  %v2486_v54 = vld [vmem:[%s4138_s3 + $0xc8] sm:$0xff] }
  0xfa   : > { %v2810_v55 = vpop.f32.mrf.mxu1 }
  0xfb   : > { %v2485_v55 = vld [vmem:[%s4138_s3 + $0xc0] sm:$0xff] }
 0x109   : > { %v724_v56 = vpop.f32.mrf.mxu0  ;;  %v798_v57 = vpop.f32.mrf.mxu1 }
 0x10a   : > { %v728_v5 = vadd.f32 %v724_v56, %v503_v50  ;;  %v802_v14 = vadd.f32 %v798_v57, %v646_v8  ;;  %v2490_v50 = vld [vmem:[%s4138_s3 + $0xe8] sm:$0xff]  ;;  %v2502_v57 = vld [vmem:[%s4138_s3 + $0x138] sm:$0xff] }
 0x10b   : > { %v2829_v58 = vpop.f32.mrf.mxu0  ;;  %v2848_v59 = vpop.f32.mrf.mxu1 }
 0x10c   : > { %v2501_v58 = vld [vmem:[%s4138_s3 + $0x130] sm:$0xff]  ;;  %v2500_v59 = vld [vmem:[%s4138_s3 + $0x128] sm:$0xff] }
 0x11b   : > { %v878_v60 = vpop.f32.mrf.mxu0  ;;  %v952_v61 = vpop.f32.mrf.mxu1 }
 0x11c   : > { %v882_v9 = vadd.f32 %v878_v60, %v728_v5  ;;  %v956_v22 = vadd.f32 %v952_v61, %v802_v14  ;;  %v2499_v60 = vld [vmem:[%s4138_s3 + $0x120] sm:$0xff]  ;;  %v2498_v61 = vld [vmem:[%s4138_s3 + $0x118] sm:$0xff] }
 0x11d   : > { %v2867_v62 = vpop.f32.mrf.mxu0  ;;  %v2886_v63 = vpop.f32.mrf.mxu1  ;;  %v2022_v5 = vld [vmem:[%s4140_s5 + $0x78] sm:$0xff] }
 0x11e   : > { %v2497_v62 = vld [vmem:[%s4138_s3 + $0x110] sm:$0xff]  ;;  %v2496_v63 = vld [vmem:[%s4138_s3 + $0x108] sm:$0xff] }
 0x12d   : > { %v1032_v12 = vpop.f32.mrf.mxu0  ;;  %v1106_v13 = vpop.f32.mrf.mxu1 }
 0x12e   : > { %v1036_v15 = vadd.f32 %v1032_v12, %v882_v9  ;;  %v1110_v25 = vadd.f32 %v1106_v13, %v956_v22 }
 0x12f   : > { %v2905_v18 = vpop.f32.mrf.mxu0  ;;  %v2924_v19 = vpop.f32.mrf.mxu1 }
 0x130   : > { %1112 = vrot.lane.b32.xlu0 %v1036_v15, %s3309_s29 }
 0x134   : > { %1117 = vrot.lane.b32.xlu0 %v1110_v25, %s3309_s29 }
 0x1a2   : > { %v1113_v28 = vpop.permute.xlu0 %1112 }
 0x1a3   : > { %v1115_v30 = vmax.f32 %v1036_v15, %v1113_v28  ;;  %v2019_v28 = vld [vmem:[%s4140_s5 + $0x60] sm:$0xff] }
 0x1a6   : > { %v1118_v29 = vpop.permute.xlu0 %1117 }
 0x1a7   : > { %v1120_v31 = vmax.f32 %v1110_v25, %v1118_v29  ;;  %v1937_v25 = vld [vmem:[%s4140_s5 + $0x20] sm:$0xff]  ;;  %v1935_v29 = vld [vmem:[%s4140_s5 + $0x10] sm:$0xff] }
 0x1a9   : > { %v1121_v33 = vmax.f32 %v1115_v30, %v1120_v31  ;;  %v2018_v30 = vld [vmem:[%s4140_s5 + $0x58] sm:$0xff] }
 0x1ab   : > { %v1128_v34 = vadd.f32 %v2462_v32, %v1121_v33  ;;  %v1934_v32 = vld [vmem:[%s4140_s5 + $0x8] sm:$0xff]  ;;  %v2017_v33 = vld [vmem:[%s4140_s5 + $0x50] sm:$0xff] }
 0x1ad   : > { %v1129_v35 = vmax.f32 %v1128_v34, 0.0 }
 0x1af   : > { %1133 = vst.msk [vmem:[#allocation2 + $0x2] sm:$0xff] %vm359_vm0, %v1129_v35 }
 0x1b6   : > { %v1137_v36 = vld [vmem:[#allocation2 + $0x1] ss:$2 sm:$0xf]  ;;  %v1135_v37 = vld [vmem:[#allocation2] ss:$2 sm:$0xf] }
 0x1b7   : > { %2942 = vmatmul.mubr.msk.f32.vlgmr.msra.gmra.mxu0 %vm359_vm0, %v1137_v36  ;;  %2961 = vmatmul.mubr.msk.f32.vlgmr.msra.gmra.mxu1 %vm359_vm0, %v1135_v37  ;;  %v1139_v38 = vld [vmem:[#allocation2 + $0x2] ss:$2 sm:$0xf]  ;;  %v1141_v47 = vld [vmem:[#allocation2 + $0x3] ss:$2 sm:$0xf] }
 0x1b8   : > { %2964 = vmatpush3.msra.mxu0 %v3665_v0  ;;  %2983 = vmatpush3.msra.mxu1 %v3670_v1  ;;  %v1143_v56 = vld [vmem:[#allocation2 + $0x4] ss:$2 sm:$0xf]  ;;  %v1145_v1 = vld [vmem:[#allocation2 + $0x5] ss:$2 sm:$0xf] }
 0x1b9   : > { %2965 = vmatprep.subr.mxu0 %v3307_v2  ;;  %2984 = vmatprep.subr.mxu1 %v3307_v2  ;;  %v2495_v0 = vld [vmem:[%s4138_s3 + $0x100] sm:$0xff]  ;;  %v2016_v37 = vld [vmem:[%s4140_s5 + $0x48] sm:$0xff] }
 0x1ba   : > { %2966 = vmatpush3.msra.mxu0 %v3679_v3  ;;  %2985 = vmatpush3.msra.mxu1 %v3684_v4  ;;  %v1940_v3 = vld [vmem:[%s4140_s5 + $0x38] sm:$0xff]  ;;  %v1939_v4 = vld [vmem:[%s4140_s5 + $0x30] sm:$0xff] }
 0x1bb   : > { %2967 = vmatprep.subr.mxu0 %v3307_v2  ;;  %2986 = vmatprep.subr.mxu1 %v3307_v2 }
 0x1bc   : > { %2968 = vmatpush3.msra.mxu0 %v3693_v6  ;;  %2987 = vmatpush3.msra.mxu1 %v3698_v7 }
 0x1bd   : > { %2969 = vmatprep.subr.mxu0 %v3307_v2  ;;  %2988 = vmatprep.subr.mxu1 %v3307_v2 }
 0x1be   : > { %2970 = vmatpush3.msra.mxu0 %v3707_v10  ;;  %2989 = vmatpush3.msra.mxu1 %v3712_v11 }
 0x1bf   : > { %2971 = vmatprep.subr.mxu0 %v3307_v2  ;;  %2990 = vmatprep.subr.mxu1 %v3307_v2 }
 0x1c0   : > { %2972 = vmatpush3.msra.mxu0 %v2466_v16  ;;  %2991 = vmatpush3.msra.mxu1 %v1149_v17 }
 0x1c1   : > { %2973 = vmatprep.subr.mxu0 %v3307_v2  ;;  %2992 = vmatprep.subr.mxu1 %v3307_v2 }
 0x1c2   : > { %2974 = vmatpush3.msra.mxu0 %v2465_v20  ;;  %2993 = vmatpush3.msra.mxu1 %v1148_v21 }
 0x1c3   : > { %2975 = vmatprep.subr.mxu0 %v3307_v2  ;;  %2994 = vmatprep.subr.mxu1 %v3307_v2 }
 0x1c4   : > { %2976 = vmatpush3.msra.mxu0 %v2464_v23  ;;  %2995 = vmatpush3.msra.mxu1 %v1147_v24  ;;  %v1938_v23 = vld [vmem:[%s4140_s5 + $0x28] sm:$0xff]  ;;  %v2021_v24 = vld [vmem:[%s4140_s5 + $0x70] sm:$0xff] }
 0x1c5   : > { %2977 = vmatprep.subr.mxu0 %v3307_v2  ;;  %2996 = vmatprep.subr.mxu1 %v3307_v2 }
 0x1c6   : > { %2978 = vmatpush3.msra.mxu0 %v2463_v26  ;;  %2979 = vmatprep.mubr.msk.f32.mxu0 %vm3308_vm1, %v3307_v2  ;;  %v2020_v26 = vld [vmem:[%s4140_s5 + $0x68] sm:$0xff] }
 0x1c7   : > { %2997 = vmatpush3.msra.mxu1 %v1146_v27  ;;  %2998 = vmatprep.mubr.msk.f32.mxu1 %vm3308_vm1, %v3307_v2  ;;  %v1936_v27 = vld [vmem:[%s4140_s5 + $0x18] sm:$0xff] }
 0x1c8   : > { %2980 = vmatmul.mubr.msk.f32.vlgmr.msra.gmra.mxu0 %vm359_vm0, %v1139_v38  ;;  %2999 = vmatmul.mubr.msk.f32.vlgmr.msra.gmra.mxu1 %vm359_vm0, %v1137_v36  ;;  %v1933_v36 = vld [vmem:[%s4140_s5] sm:$0xff] }
 0x1c9   : > { %3001 = vmatprep.subr.mxu0 %v3307_v2  ;;  %3020 = vmatprep.subr.mxu1 %v3307_v2 }
 0x1ca   : > { %3002 = vmatpush3.msra.mxu0 %v2482_v39  ;;  %3021 = vmatpush3.msra.mxu1 %v2482_v39 }
 0x1cb   : > { %3003 = vmatprep.subr.mxu0 %v3307_v2  ;;  %3022 = vmatprep.subr.mxu1 %v3307_v2 }
 0x1cc   : > { %3004 = vmatpush3.msra.mxu0 %v2481_v40  ;;  %3023 = vmatpush3.msra.mxu1 %v2481_v40 }
 0x1cd   : > { %3005 = vmatprep.subr.mxu0 %v3307_v2  ;;  %3024 = vmatprep.subr.mxu1 %v3307_v2 }
 0x1ce   : > { %3006 = vmatpush3.msra.mxu0 %v2480_v41  ;;  %3025 = vmatpush3.msra.mxu1 %v2480_v41 }
 0x1cf   : > { %3007 = vmatprep.subr.mxu0 %v3307_v2  ;;  %3026 = vmatprep.subr.mxu1 %v3307_v2 }
 0x1d0   : > { %3008 = vmatpush3.msra.mxu0 %v2479_v42  ;;  %3027 = vmatpush3.msra.mxu1 %v2479_v42  ;;  %v2015_v42 = vld [vmem:[%s4140_s5 + $0x40] sm:$0xff] }
 0x1d1   : > { %3009 = vmatprep.subr.mxu0 %v3307_v2  ;;  %3028 = vmatprep.subr.mxu1 %v3307_v2 }
 0x1d2   : > { %3010 = vmatpush3.msra.mxu0 %v2478_v43  ;;  %3029 = vmatpush3.msra.mxu1 %v2478_v43 }
 0x1d3   : > { %3011 = vmatprep.subr.mxu0 %v3307_v2  ;;  %3030 = vmatprep.subr.mxu1 %v3307_v2 }
 0x1d4   : > { %3012 = vmatpush3.msra.mxu0 %v2477_v44  ;;  %3031 = vmatpush3.msra.mxu1 %v2477_v44 }
 0x1d5   : > { %3013 = vmatprep.subr.mxu0 %v3307_v2  ;;  %3032 = vmatprep.subr.mxu1 %v3307_v2 }
 0x1d6   : > { %3014 = vmatpush3.msra.mxu0 %v2476_v45  ;;  %3033 = vmatpush3.msra.mxu1 %v2476_v45 }
 0x1d7   : > { %3015 = vmatprep.subr.mxu0 %v3307_v2  ;;  %3034 = vmatprep.subr.mxu1 %v3307_v2 }
 0x1d8   : > { %3016 = vmatpush3.msra.mxu0 %v2475_v46  ;;  %3017 = vmatprep.mubr.msk.f32.mxu0 %vm3308_vm1, %v3307_v2 }
 0x1d9   : > { %3035 = vmatpush3.msra.mxu1 %v2475_v46  ;;  %3036 = vmatprep.mubr.msk.f32.mxu1 %vm3308_vm1, %v3307_v2 }
 0x1da   : > { %3018 = vmatmul.mubr.msk.f32.vlgmr.msra.gmra.mxu0 %vm359_vm0, %v1139_v38  ;;  %3037 = vmatmul.mubr.msk.f32.vlgmr.msra.gmra.mxu1 %vm359_vm0, %v1141_v47 }
 0x1db   : > { %3039 = vmatprep.subr.mxu0 %v3307_v2  ;;  %3058 = vmatprep.subr.mxu1 %v3307_v2 }
 0x1dc   : > { %3040 = vmatpush3.msra.mxu0 %v2492_v48  ;;  %3059 = vmatpush3.msra.mxu1 %v2492_v48 }
 0x1dd   : > { %3041 = vmatprep.subr.mxu0 %v3307_v2  ;;  %3060 = vmatprep.subr.mxu1 %v3307_v2 }
 0x1de   : > { %3042 = vmatpush3.msra.mxu0 %v2491_v49  ;;  %3061 = vmatpush3.msra.mxu1 %v2491_v49 }
 0x1df   : > { %3043 = vmatprep.subr.mxu0 %v3307_v2  ;;  %3062 = vmatprep.subr.mxu1 %v3307_v2 }
 0x1e0   : > { %3044 = vmatpush3.msra.mxu0 %v2490_v50  ;;  %3063 = vmatpush3.msra.mxu1 %v2490_v50 }
 0x1e1   : > { %3045 = vmatprep.subr.mxu0 %v3307_v2  ;;  %3064 = vmatprep.subr.mxu1 %v3307_v2 }
 0x1e2   : > { %3046 = vmatpush3.msra.mxu0 %v2489_v51  ;;  %3065 = vmatpush3.msra.mxu1 %v2489_v51  ;;  %v2505_v51 = vld [vmem:[%s4139_s4] ss:$0 sm:$0xff] }
 0x1e3   : > { %3047 = vmatprep.subr.mxu0 %v3307_v2  ;;  %3066 = vmatprep.subr.mxu1 %v3307_v2 }
 0x1e4   : > { %3048 = vmatpush3.msra.mxu0 %v2488_v52  ;;  %3067 = vmatpush3.msra.mxu1 %v2488_v52 }
 0x1e5   : > { %3049 = vmatprep.subr.mxu0 %v3307_v2  ;;  %3068 = vmatprep.subr.mxu1 %v3307_v2 }
 0x1e6   : > { %3050 = vmatpush3.msra.mxu0 %v2487_v53  ;;  %3069 = vmatpush3.msra.mxu1 %v2487_v53 }
 0x1e7   : > { %3051 = vmatprep.subr.mxu0 %v3307_v2  ;;  %3070 = vmatprep.subr.mxu1 %v3307_v2 }
 0x1e8   : > { %3052 = vmatpush3.msra.mxu0 %v2486_v54  ;;  %3071 = vmatpush3.msra.mxu1 %v2486_v54 }
 0x1e9   : > { %3053 = vmatprep.subr.mxu0 %v3307_v2  ;;  %3072 = vmatprep.subr.mxu1 %v3307_v2 }
 0x1ea   : > { %3054 = vmatpush3.msra.mxu0 %v2485_v55  ;;  %3055 = vmatprep.mubr.msk.f32.mxu0 %vm3308_vm1, %v3307_v2 }
 0x1eb   : > { %3073 = vmatpush3.msra.mxu1 %v2485_v55  ;;  %3074 = vmatprep.mubr.msk.f32.mxu1 %vm3308_vm1, %v3307_v2  ;;  %v2104_v55 = vld [vmem:[%s4140_s5 + $0xb8] sm:$0xff] }
 0x1ec   : > { %3056 = vmatmul.mubr.msk.f32.vlgmr.msra.gmra.mxu0 %vm359_vm0, %v1141_v47  ;;  %3075 = vmatmul.mubr.msk.f32.vlgmr.msra.gmra.mxu1 %vm359_vm0, %v1143_v56 }
 0x1ed   : > { %3077 = vmatprep.subr.mxu0 %v3307_v2  ;;  %3096 = vmatprep.subr.mxu1 %v3307_v2 }
 0x1ee   : > { %3078 = vmatpush3.msra.mxu0 %v2502_v57  ;;  %3097 = vmatpush3.msra.mxu1 %v2502_v57  ;;  %v2103_v57 = vld [vmem:[%s4140_s5 + $0xb0] sm:$0xff] }
 0x1ef   : > { %3079 = vmatprep.subr.mxu0 %v3307_v2  ;;  %3098 = vmatprep.subr.mxu1 %v3307_v2 }
 0x1f0   : > { %3080 = vmatpush3.msra.mxu0 %v2501_v58  ;;  %3099 = vmatpush3.msra.mxu1 %v2501_v58  ;;  %v2186_v58 = vld [vmem:[%s4140_s5 + $0xf8] sm:$0xff] }
 0x1f1   : > { %3081 = vmatprep.subr.mxu0 %v3307_v2  ;;  %3100 = vmatprep.subr.mxu1 %v3307_v2 }
 0x1f2   : > { %3082 = vmatpush3.msra.mxu0 %v2500_v59  ;;  %3101 = vmatpush3.msra.mxu1 %v2500_v59  ;;  %v2102_v59 = vld [vmem:[%s4140_s5 + $0xa8] sm:$0xff] }
 0x1f3   : > { %3083 = vmatprep.subr.mxu0 %v3307_v2  ;;  %3102 = vmatprep.subr.mxu1 %v3307_v2 }
 0x1f4   : > { %3084 = vmatpush3.msra.mxu0 %v2499_v60  ;;  %3103 = vmatpush3.msra.mxu1 %v2499_v60  ;;  %v2185_v60 = vld [vmem:[%s4140_s5 + $0xf0] sm:$0xff] }
 0x1f5   : > { %3085 = vmatprep.subr.mxu0 %v3307_v2  ;;  %3104 = vmatprep.subr.mxu1 %v3307_v2 }
 0x1f6   : > { %3086 = vmatpush3.msra.mxu0 %v2498_v61  ;;  %3105 = vmatpush3.msra.mxu1 %v2498_v61  ;;  %v2101_v61 = vld [vmem:[%s4140_s5 + $0xa0] sm:$0xff] }
 0x1f7   : > { %3087 = vmatprep.subr.mxu0 %v3307_v2  ;;  %3106 = vmatprep.subr.mxu1 %v3307_v2 }
 0x1f8   : > { %3088 = vmatpush3.msra.mxu0 %v2497_v62  ;;  %3107 = vmatpush3.msra.mxu1 %v2497_v62  ;;  %v2184_v62 = vld [vmem:[%s4140_s5 + $0xe8] sm:$0xff] }
 0x1f9   : > { %3089 = vmatprep.subr.mxu0 %v3307_v2  ;;  %3108 = vmatprep.subr.mxu1 %v3307_v2 }
 0x1fa   : > { %3090 = vmatpush3.msra.mxu0 %v2496_v63  ;;  %3109 = vmatpush3.msra.mxu1 %v2496_v63  ;;  %v2100_v63 = vld [vmem:[%s4140_s5 + $0x98] sm:$0xff] }
 0x1fb   : > { %3091 = vmatprep.subr.mxu0 %v3307_v2  ;;  %3110 = vmatprep.subr.mxu1 %v3307_v2 }
 0x1fc   : > { %3092 = vmatpush3.msra.mxu0 %v2495_v0  ;;  %3093 = vmatprep.mubr.msk.f32.mxu0 %vm3308_vm1, %v3307_v2 }
 0x1fd   : > { %3111 = vmatpush3.msra.mxu1 %v2495_v0  ;;  %3112 = vmatprep.mubr.msk.f32.mxu1 %vm3308_vm1, %v3307_v2  ;;  %v2183_v0 = vld [vmem:[%s4140_s5 + $0xe0] sm:$0xff] }
 0x1fe   : > { %3094 = vmatmul.mubr.msk.f32.vlgmr.msra.gmra.mxu0 %vm359_vm0, %v1143_v56  ;;  %3113 = vmatmul.mubr.msk.f32.vlgmr.msra.gmra.mxu1 %vm359_vm0, %v1145_v1  ;;  %v2099_v1 = vld [vmem:[%s4140_s5 + $0x90] sm:$0xff] }
 0x1ff   : > { %3115 = vmatprep.subr.mxu0 %v3307_v2  ;;  %3134 = vmatprep.subr.mxu1 %v3307_v2 }
 0x200   : > { %3131 = vmatprep.mubr.msk.f32.mxu0 %vm3308_vm1, %v3307_v2  ;;  %3150 = vmatprep.mubr.msk.f32.mxu1 %vm3308_vm1, %v3307_v2 }
 0x201   : > { %3116 = vmatpush3.msra.mxu0 %v1940_v3  ;;  %3135 = vmatpush3.msra.mxu1 %v2022_v5  ;;  %v2182_v3 = vld [vmem:[%s4140_s5 + $0xd8] sm:$0xff]  ;;  %v2181_v5 = vld [vmem:[%s4140_s5 + $0xd0] sm:$0xff] }
 0x202   : > { %3117 = vmatprep.subr.mxu0 %v3307_v2  ;;  %3136 = vmatprep.subr.mxu1 %v3307_v2 }
 0x203   : > { %3118 = vmatpush3.msra.mxu0 %v1939_v4  ;;  %3137 = vmatpush3.msra.mxu1 %v2021_v24  ;;  %v2098_v4 = vld [vmem:[%s4140_s5 + $0x88] sm:$0xff] }
 0x204   : > { %3119 = vmatprep.subr.mxu0 %v3307_v2  ;;  %3138 = vmatprep.subr.mxu1 %v3307_v2 }
 0x205   : > { %3120 = vmatpush3.msra.mxu0 %v1938_v23  ;;  %3139 = vmatpush3.msra.mxu1 %v2020_v26 }
 0x206   : > { %3121 = vmatprep.subr.mxu0 %v3307_v2  ;;  %3140 = vmatprep.subr.mxu1 %v3307_v2 }
 0x207   : > { %3122 = vmatpush3.msra.mxu0 %v1937_v25  ;;  %3141 = vmatpush3.msra.mxu1 %v2019_v28  ;;  %v2266_v28 = vld [vmem:[%s4143_s8] sm:$0x1] }
 0x208   : > { %3123 = vmatprep.subr.mxu0 %v3307_v2  ;;  %3142 = vmatprep.subr.mxu1 %v3307_v2 }
 0x209   : > { %3124 = vmatpush3.msra.mxu0 %v1936_v27  ;;  %3143 = vmatpush3.msra.mxu1 %v2018_v30 }
 0x20a   : > { %3125 = vmatprep.subr.mxu0 %v3307_v2  ;;  %3144 = vmatprep.subr.mxu1 %v3307_v2 }
 0x20b   : > { %3126 = vmatpush3.msra.mxu0 %v1935_v29  ;;  %3145 = vmatpush3.msra.mxu1 %v2017_v33 }
 0x20c   : > { %3127 = vmatprep.subr.mxu0 %v3307_v2  ;;  %3146 = vmatprep.subr.mxu1 %v3307_v2 }
 0x20d   : > { %3128 = vmatpush3.msra.mxu0 %v1934_v32  ;;  %3147 = vmatpush3.msra.mxu1 %v2016_v37 }
 0x20e   : > { %3129 = vmatprep.subr.mxu0 %v3307_v2  ;;  %3148 = vmatprep.subr.mxu1 %v3307_v2 }
 0x20f   : > { %3130 = vmatpush3.msra.mxu0 %v1933_v36  ;;  %3149 = vmatpush3.msra.mxu1 %v2015_v42 }
 0x210   : > { %3153 = vmatprep.subr.mxu0 %v3307_v2  ;;  %3172 = vmatprep.subr.mxu1 %v3307_v2 }
 0x277   : > { %v1232_v6 = vpop.f32.mrf.mxu0  ;;  %v1305_v7 = vpop.f32.mrf.mxu1 }
 0x278   : > { %v1306_v8 = vadd.f32 %v1305_v7, %v1232_v6  ;;  %v2097_v6 = vld [vmem:[%s4140_s5 + $0x80] sm:$0xff]  ;;  %v2180_v7 = vld [vmem:[%s4140_s5 + $0xc8] sm:$0xff] }
 0x279   : > { %v2943_v9 = vpop.f32.mrf.mxu0  ;;  %v2962_v10 = vpop.f32.mrf.mxu1 }
 0x27a   : > { %v2179_v9 = vld [vmem:[%s4140_s5 + $0xc0] sm:$0xff] }
 0x288   : > { %v1378_v11 = vpop.f32.mrf.mxu0  ;;  %v1448_v12 = vpop.f32.mrf.mxu1 }
 0x289   : > { %v1449_v34 = vadd.f32 %v1448_v12, %v1378_v11  ;;  %v2265_v11 = vld [vmem:[%s4142_s7 + $0x18] sm:$0xff]  ;;  %v2264_v12 = vld [vmem:[%s4142_s7 + $0x10] sm:$0xff] }
 0x28a   : > { %v2981_v13 = vpop.f32.mrf.mxu0  ;;  %v3000_v14 = vpop.f32.mrf.mxu1 }
 0x28b   : > { %v2263_v13 = vld [vmem:[%s4142_s7 + $0x8] sm:$0xff]  ;;  %v2262_v14 = vld [vmem:[%s4142_s7] sm:$0xff] }
 0x29a   : > { %v1527_v15 = vpop.f32.mrf.mxu0  ;;  %v1601_v16 = vpop.f32.mrf.mxu1 }
 0x29b   : > { %v1531_v31 = vadd.f32 %v1527_v15, %v1306_v8  ;;  %v1605_v40 = vadd.f32 %v1601_v16, %v1449_v34 }
 0x29c   : > { %v3019_v17 = vpop.f32.mrf.mxu0  ;;  %v3038_v18 = vpop.f32.mrf.mxu1 }
 0x2ac   : > { %v1681_v19 = vpop.f32.mrf.mxu0  ;;  %v1755_v20 = vpop.f32.mrf.mxu1 }
 0x2ad   : > { %v1685_v35 = vadd.f32 %v1681_v19, %v1531_v31  ;;  %v1759_v45 = vadd.f32 %v1755_v20, %v1605_v40  ;;  %v1941_v19 = vld [vmem:[%s4141_s6] sm:$0x1] }
 0x2ae   : > { %v3057_v21 = vpop.f32.mrf.mxu0  ;;  %v3076_v22 = vpop.f32.mrf.mxu1 }
 0x2be   : > { %v1835_v38 = vpop.f32.mrf.mxu0  ;;  %v1909_v39 = vpop.f32.mrf.mxu1 }
 0x2bf   : > { %v1839_v41 = vadd.f32 %v1835_v38, %v1685_v35  ;;  %v1913_v46 = vadd.f32 %v1909_v39, %v1759_v45 }
 0x2c0   : > { %v3095_v43 = vpop.f32.mrf.mxu0  ;;  %v3114_v44 = vpop.f32.mrf.mxu1 }
 0x2c1   : > { %1915 = vrot.lane.b32.xlu1 %v1839_v41, %s3309_s29 }
 0x2c5   : > { %1920 = vrot.lane.b32.xlu1 %v1913_v46, %s3309_s29  ;;  %s2343_s29 = scalar_lea.sflag [#allocation4], %s323_s24 }
 0x333   : > { %v1916_v47 = vpop.permute.xlu1 %1915 }
 0x334   : > { %v1918_v49 = vmax.f32 %v1839_v41, %v1916_v47 }
 0x337   : > { %v1921_v48 = vpop.permute.xlu1 %1920 }
 0x338   : > { %v1923_v50 = vmax.f32 %v1913_v46, %v1921_v48 }
 0x33a   : > { %v1924_v52 = vmax.f32 %v1918_v49, %v1923_v50 }
 0x33c   : > { %v1931_v53 = vadd.f32 %v2505_v51, %v1924_v52 }
 0x33e   : > { %v1932_v54 = vmax.f32 %v1931_v53, 0.0 }
 0x340   : > { %3132 = vmatmul.mubr.msk.f32.vlgmr.msra.gmra.mxu0 %vm359_vm0, %v1932_v54  ;;  %v2023_v56 = vrot.slane %v1932_v54, 1  ;;  %v2105_v8 = vrot.slane %v1932_v54, 2  ;;  %v2187_v10 = vrot.slane %v1932_v54, 3 }
 0x341   : > { %3154 = vmatpush3.msra.mxu0 %v2104_v55  ;;  %3169 = vmatprep.mubr.msk.f32.mxu0 %vm3308_vm1, %v3307_v2 }
 0x342   : > { %3155 = vmatprep.subr.mxu0 %v3307_v2  ;;  %3151 = vmatmul.mubr.msk.f32.vlgmr.msra.gmra.mxu1 %vm359_vm0, %v2023_v56 }
 0x343   : > { %3156 = vmatpush3.msra.mxu0 %v2103_v57  ;;  %3173 = vmatpush3.msra.mxu1 %v2186_v58 }
 0x344   : > { %3157 = vmatprep.subr.mxu0 %v3307_v2  ;;  %3174 = vmatprep.subr.mxu1 %v3307_v2 }
 0x345   : > { %3158 = vmatpush3.msra.mxu0 %v2102_v59  ;;  %3175 = vmatpush3.msra.mxu1 %v2185_v60 }
 0x346   : > { %3159 = vmatprep.subr.mxu0 %v3307_v2  ;;  %3176 = vmatprep.subr.mxu1 %v3307_v2 }
 0x347   : > { %3160 = vmatpush3.msra.mxu0 %v2101_v61  ;;  %3177 = vmatpush3.msra.mxu1 %v2184_v62 }
 0x348   : > { %3161 = vmatprep.subr.mxu0 %v3307_v2  ;;  %3178 = vmatprep.subr.mxu1 %v3307_v2 }
 0x349   : > { %3162 = vmatpush3.msra.mxu0 %v2100_v63  ;;  %3179 = vmatpush3.msra.mxu1 %v2183_v0 }
 0x34a   : > { %3163 = vmatprep.subr.mxu0 %v3307_v2  ;;  %3180 = vmatprep.subr.mxu1 %v3307_v2 }
 0x34b   : > { %3164 = vmatpush3.msra.mxu0 %v2099_v1  ;;  %3181 = vmatpush3.msra.mxu1 %v2182_v3 }
 0x34c   : > { %3165 = vmatprep.subr.mxu0 %v3307_v2  ;;  %3182 = vmatprep.subr.mxu1 %v3307_v2 }
 0x34d   : > { %3166 = vmatpush3.msra.mxu0 %v2098_v4  ;;  %3183 = vmatpush3.msra.mxu1 %v2181_v5 }
 0x34e   : > { %3167 = vmatprep.subr.mxu0 %v3307_v2  ;;  %3184 = vmatprep.subr.mxu1 %v3307_v2 }
 0x34f   : > { %3168 = vmatpush3.msra.mxu0 %v2097_v6  ;;  %3185 = vmatpush3.msra.mxu1 %v2180_v7 }
 0x350   : > { %3170 = vmatmul.mubr.msk.f32.vlgmr.msra.gmra.mxu0 %vm359_vm0, %v2105_v8  ;;  %3186 = vmatprep.subr.mxu1 %v3307_v2 }
 0x351   : > { %3187 = vmatpush3.msra.mxu1 %v2179_v9  ;;  %3188 = vmatprep.mubr.msk.f32.mxu1 %vm3308_vm1, %v3307_v2 }
 0x352   : > { %3189 = vmatmul.mubr.msk.f32.vlgmr.msra.gmra.mxu1 %vm359_vm0, %v2187_v10  ;;  %3191 = vmatprep.subr.mxu0 %v3307_v2 }
 0x353   : > { %3199 = vmatprep.mubr.msk.f32.mxu0 %vm3308_vm1, %v3307_v2  ;;  %3192 = vmatpush3.msra.mxu0 %v2265_v11 }
 0x354   : > { %3193 = vmatprep.subr.mxu0 %v3307_v2 }
 0x355   : > { %3194 = vmatpush3.msra.mxu0 %v2264_v12 }
 0x356   : > { %3195 = vmatprep.subr.mxu0 %v3307_v2 }
 0x357   : > { %3196 = vmatpush3.msra.mxu0 %v2263_v13 }
 0x358   : > { %3197 = vmatprep.subr.mxu0 %v3307_v2 }
 0x359   : > { %3198 = vmatpush3.msra.mxu0 %v2262_v14 }
 0x400   : > { %v2011_v15 = vpop.f32.mrf.mxu0 }
 0x401   : > { %v2012_v20 = vadd.f32 %v2011_v15, %v1941_v19 }
 0x402   : > { %v3133_v16 = vpop.f32.mrf.mxu0  ;;  %v2092_v17 = vpop.f32.mrf.mxu1 }
 0x403   : > { %v2096_v21 = vadd.f32 %v2092_v17, %v2012_v20 }
 0x404   : > { %v3152_v18 = vpop.f32.mrf.mxu1 }
 0x410   : > { %v2174_v22 = vpop.f32.mrf.mxu0 }
 0x411   : > { %v2178_v23 = vadd.f32 %v2174_v22, %v2096_v21 }
 0x412   : > { %v3171_v2 = vpop.f32.mrf.mxu0  ;;  %v2256_v24 = vpop.f32.mrf.mxu1 }
 0x413   : > { %v2260_v25 = vadd.f32 %v2256_v24, %v2178_v23 }
 0x414   : > { %v3190_v26 = vpop.f32.mrf.mxu1 }
 0x415   : > { %v2261_v27 = vmax.f32 %v2260_v25, 0.0 }
 0x417   : > { %3200 = vmatmul.mubr.msk.f32.vlgmr.msra.gmra.mxu0 %vm2267_vm3, %v2261_v27 }
 0x4d7   : > { %v2337_v29 = vpop.f32.mrf.mxu0 }
 0x4d8   : > { %v2338_v30 = vadd.f32 %v2337_v29, %v2266_v28 }
 0x4d9   : > { %v3201_v31 = vpop.f32.mrf.mxu0 }
 0x4da   : > { %2341 = vst [vmem:[%s324_s28] sm:$0x1] %v2338_v30 }
 0x4db   : > { %3258 = shalt.err (!%p3255_p3)
}
 0x4dc   : > { %s3259_s26 = scalar_lea.hbm %s4100_s23, 16  ;;  %s3263_s28 = scalar_lea.hbm %s4144_s9, 32 }
 0x4dd   : > { %p3260_p4 = scmp.ne.s32.totalorder %s4100_s23, %s3259_s26  ;;  %p3264_p9 = scmp.lt.s32.totalorder %s4100_s23, %s4144_s9 }
 0x4de   : > { %p3265_p10 = scmp.lt.s32.totalorder %s3263_s28, %s3259_s26 }
 0x4df   : > { %p3261_p7 = pnand %p3260_p4, %p3399_p5 }
 0x4e0   : > { %p3266_p11 = por %p3265_p10, %p3264_p9 }
 0x4e1   : > { %p3262_p8 = pneg %p3261_p7 }
 0x4e3   : > { %p3267_p12 = pnand %p3266_p11, %p3262_p8 }
 0x4e5   : > { %3270 = shalt.err (!%p3267_p12)
}
 0x4e6   : > { %3203 = dma.vmem_to_hbm [thread:$0]  (%p3399_p5), %s2356_s16, 16, %s4100_s23, %s2343_s29  }
 0x4e7 PF: > { %p3209_p13 = scmp.ge.s32.totalorder %s3305_s12, 2  ;;  %s2367_s14 = sand.u32 1, %s3293_s30  }
 0x4e8   : > { %s2368_s21 = scalar_lea.sflag [#allocation4], %s2367_s14 }
 0x4e9   : > { %p3206_p0 = pnand %p3209_p13, %p3403_p6 }
 0x4eb   : > { %p3207_p1 = pneg %p3206_p0 }
 0x4ed   : > { %3288 = dma.done.wait (%p3207_p1), %s2368_s21, 16  }
 0x4ee   : > { %3290 = vsyncadd (%p3207_p1), %s2368_s21, 4294967280  ;;  %p19_p2 = scmp.ge.s32.totalorder %s3386_s15, 4   ;;  %s4147_s30 = smov %s3297_s10 }
 0x4ef   : > { %s4148_s10 = smov %s3301_s11  ;;  %s4149_s11 = smov %s3397_s18 }
 0x4f0   : > { %s4150_s12 = smov %s3386_s15  ;;  %21 = sbr.rel (!%p19_p2) target bundleno = 3 (0x3), region = 109 }
 0x4f5   :  { %2372 = vsyncpa [#allocation4], 1 }
 0x4f6   :  { %2374 = vsyncpa [#allocation4 + $0x1], 1 }

</bundles_post_ra>
